<compile_context>
chip_gen: v7x
topology: tpu7x:2x2x1
jax: 0.10.0
libtpu: 0.0.40
codegen_flags: <defaults>
</compile_context>

<pallas_src>
import functools

import jax
import jax.numpy as jnp
from jax import lax
from jax.experimental import pallas as pl
from jax.experimental.pallas import tpu as pltpu


HIDDEN_DIM = 512   # Positive_MLP default
NUM_LAYERS = 3

# dot_general dims: contract lhs dim 1 with rhs dim 1 (A @ B.T without an
# explicit transpose of B) -> output (lhs_rows, rhs_rows).
_NT_DIMS = (((1,), (1,)), ((), ()))


def _round_up(x, m):
    return ((x + m - 1) // m) * m


def _sigmoid_1eup(x):
    # sigmoid(x) == 0.5 * tanh(0.5 * x) + 0.5 : one EUP push + cheap VPU ops.
    return 0.5 * jnp.tanh(0.5 * x) + 0.5


# ----------------------------------------------------------------------------
# Parameter init (deterministic, mirrors the PyTorch module's shapes)
# ----------------------------------------------------------------------------
def _xavier_normal(key, shape):
    fan_in, fan_out = shape
    std = (2.0 / (fan_in + fan_out)) ** 0.5
    return std * jax.random.normal(key, shape, dtype=jnp.float32)


def init_positive_mlp_params(key, know_num, num_layers=NUM_LAYERS, hidden_dim=HIDDEN_DIM):
    """Linear(know_num,512) -> Linear(512,256) -> Linear(256,128) -> Linear(128,1)."""
    dims = [know_num] + [hidden_dim // (2 ** i) for i in range(num_layers)] + [1]
    params = []
    for i in range(len(dims) - 1):
        key, wk, bk = jax.random.split(key, 3)
        w = _xavier_normal(wk, (dims[i], dims[i + 1]))          # stored (in, out)
        bound = 1.0 / (dims[i] ** 0.5)                          # PyTorch default bias init
        b = jax.random.uniform(bk, (1, dims[i + 1]), jnp.float32, -bound, bound)
        params += [w, b]
    return params


# ----------------------------------------------------------------------------
# Pallas kernel: whole decoder forward for one batch tile
# ----------------------------------------------------------------------------
def _decoder_kernel(zcat_ref, kp_ref, kt_ref,
                    w1_ref, b1_ref, w2_ref, b2_ref, w3_ref, b3_ref,
                    w4t_ref, b4_ref, out_ref, *, trans_dtype):
    TB = kp_ref.shape[0]
    cdt = w1_ref.dtype          # MXU input dtype (bf16 or f32)

    # One fused embedding matmul for students + exercises:
    #   (2*TB, D) @ (D, K_pad) -> (2*TB, K_pad), f32 accumulation on the MXU.
    logits = jnp.dot(zcat_ref[...], kt_ref[...], preferred_element_type=jnp.float32)
    # Mastery sigmoids + difference stay f32 (near-cancellation is accuracy
    # sensitive); tanh-form sigmoid is a single EUP op per element.
    s = _sigmoid_1eup(logits)
    # state = knowledge_point * (sigmoid(stu) - sigmoid(exe)); padded cols are 0.
    state = kp_ref[...].astype(jnp.float32) * (s[:TB, :] - s[TB:, :])   # (TB, K_pad) f32

    # Positive_MLP: (Linear -> Dropout(=identity at eval) -> Tanh) x 3 -> Linear -> Sigmoid
    # Matmuls accumulate in f32; tanh runs in trans_dtype (bf16 halves EUP
    # pressure on v6e/v7x, keep f32 on v5e which has no bf16 EUP).
    def lin_tanh(x, w_ref, b_ref):
        y = jnp.dot(x.astype(cdt), w_ref[...],
                    preferred_element_type=jnp.float32) + b_ref[...]
        return jnp.tanh(y.astype(trans_dtype))

    h = lin_tanh(state, w1_ref, b1_ref)     # (TB, 512)
    h = lin_tanh(h, w2_ref, b2_ref)         # (TB, 256)
    h = lin_tanh(h, w3_ref, b3_ref)         # (TB, 128)

    # Output head: contract w4^T (1, h3) against h (TB, h3) along h3 with "NT"
    # dimension numbers -> (1, TB) directly.  No explicit full-width transpose
    # of h; the store stays a lane-dense unmasked (1, TB) vst.
    y = lax.dot_general(w4t_ref[...], h.astype(cdt), _NT_DIMS,
                        preferred_element_type=jnp.float32) + b4_ref[...]
    out_ref[...] = _sigmoid_1eup(y)


# ----------------------------------------------------------------------------
# Wrapper (glue: gather + zero-padding + layout prep; all compute in kernel)
# ----------------------------------------------------------------------------
def simple_cd_decoder_forward(z, student_id, exercise_id, knowledge_point, params,
                              *, stu_num, prob_num, batch_tile=2048,
                              compute_dtype=jnp.bfloat16,
                              transcendental_dtype=jnp.float32):
    w1, b1, w2, b2, w3, b3, w4, b4 = params
    know_num = w1.shape[0]
    h1, h2, h3 = w1.shape[1], w2.shape[1], w3.shape[1]
    emb_dim = z.shape[1]
    batch = int(student_id.shape[0])

    # -------- generation-aware VMEM budget / batch-tile cap ------------------
    try:
        vmem_cap = int(pltpu.get_tpu_info().vmem_capacity_bytes)
    except Exception:
        vmem_cap = 64 << 20                                   # conservative (v7x per-TC)
    vmem_limit = min(max(vmem_cap - (16 << 20), 32 << 20), 64 << 20)   # ~48 MiB v7x, 64 MiB v5e/v6e
    tb_cap = 2048 if vmem_cap <= (64 << 20) else 4096

    K_pad = _round_up(know_num, 128)
    itemsize = jnp.dtype(compute_dtype).itemsize
    # Rough per-row live set: f32 intermediates (logits/s/state + first hidden)
    # plus double-buffered compute-dtype inputs. Keeps the tile inside VMEM.
    row_bytes = (3 * K_pad + h1 + h2) * 4 + 2 * (2 * emb_dim + K_pad) * itemsize
    vmem_rows = max(128, (int(0.6 * vmem_limit) // row_bytes) // 128 * 128)

    TB = max(128, min(_round_up(min(batch_tile, batch), 128), tb_cap, vmem_rows))
    # Give megacore (v7x) at least 2 grid steps when the batch is big enough.
    if batch > 256 and _round_up(batch, TB) // TB < 2:
        TB = max(128, _round_up((batch + 1) // 2, 128))
    batch_p = _round_up(batch, TB)
    nb = batch_p // TB

    # -------- glue: single interleaved gather + exact zero padding -----------
    # Padded knowledge cols: sigmoid(0)-sigmoid(0)=0; padded kp cols / w1 rows
    # are 0, so padded lanes contribute exactly nothing. Padded batch rows are
    # sliced off at the end.
    pad_n = batch_p - batch
    sid = jnp.pad(student_id.astype(jnp.int32), (0, pad_n))
    eid = jnp.pad(exercise_id.astype(jnp.int32), (0, pad_n)) + stu_num
    # Per tile: TB student rows followed by their TB exercise rows -> one
    # contiguous (2*TB, D) block, gathered from z in a single fused gather.
    idx = jnp.concatenate([sid.reshape(nb, TB), eid.reshape(nb, TB)], axis=1).reshape(-1)
    zcat = z[idx].astype(compute_dtype)                               # (nb*2*TB, D)

    kt_t = jnp.pad(jnp.transpose(z[stu_num + prob_num:]),
                   ((0, 0), (0, K_pad - know_num))).astype(compute_dtype)   # (D, K_pad)
    # Mask ships narrow (exact for 0/1 masks); upcast to f32 inside the kernel.
    kp_p = jnp.pad(knowledge_point.astype(jnp.float32),
                   ((0, pad_n), (0, K_pad - know_num))).astype(compute_dtype)
    w1_p = jnp.pad(w1, ((0, K_pad - know_num), (0, 0))).astype(compute_dtype)
    w4t = jnp.transpose(w4).astype(compute_dtype)                     # (1, h3)

    args = (zcat, kp_p, kt_t,
            w1_p, b1, w2.astype(compute_dtype), b2, w3.astype(compute_dtype), b3,
            w4t, b4)

    # Weights/biases stay resident in VMEM across all grid steps (they total
    # <1 MiB, so the default double-buffer on them costs negligible VMEM).
    def resident(shape):
        return pl.BlockSpec(shape, lambda i: (0, 0))

    in_specs = [
        pl.BlockSpec((2 * TB, emb_dim), lambda i: (i, 0)),   # fused stu/exe embeddings
        pl.BlockSpec((TB, K_pad), lambda i: (i, 0)),         # knowledge_point mask
        resident((emb_dim, K_pad)),                          # knowledge_ts^T (padded)
        resident((K_pad, h1)), resident((1, h1)),            # w1 (padded), b1
        resident((h1, h2)), resident((1, h2)),               # w2, b2
        resident((h2, h3)), resident((1, h3)),               # w3, b3
        resident((1, h3)), resident((1, 1)),                 # w4^T, b4
    ]
    out_spec = pl.BlockSpec((1, TB), lambda i: (0, i))       # lane-dense output row

    flops = 2 * batch_p * (2 * emb_dim * K_pad + K_pad * h1 + h1 * h2 + h2 * h3 + h3)
    transcendentals = batch_p * (2 * K_pad + h1 + h2 + h3 + 1)
    bytes_accessed = sum(int(a.size) * int(a.dtype.itemsize) for a in args) + batch_p * 4

    kernel = functools.partial(_decoder_kernel, trans_dtype=transcendental_dtype)
    out = pl.pallas_call(
        kernel,
        grid=(nb,),
        in_specs=in_specs,
        out_specs=out_spec,
        out_shape=jax.ShapeDtypeStruct((1, batch_p), jnp.float32),
        compiler_params=pltpu.CompilerParams(
            dimension_semantics=("parallel",),               # megacore on v7x; no-op v5e/v6e
            vmem_limit_bytes=int(vmem_limit)),
        cost_estimate=pl.CostEstimate(
            flops=int(flops),
            transcendentals=int(transcendentals),
            bytes_accessed=int(bytes_accessed)),
    )(*args)

    return out.reshape(-1)[:batch]                           # matches .view(-1)


# ----------------------------------------------------------------------------
# Pure-JAX reference (for correctness checking only)
# ----------------------------------------------------------------------------
def _reference_forward(z, student_id, exercise_id, knowledge_point, params,
                       *, stu_num, prob_num):
    knowledge_ts = z[stu_num + prob_num:]
    s_stu = jax.nn.sigmoid(z[student_id] @ knowledge_ts.T)
    s_exe = jax.nn.sigmoid(z[exercise_id + stu_num] @ knowledge_ts.T)
    state = knowledge_point * (s_stu - s_exe)
    w1, b1, w2, b2, w3, b3, w4, b4 = params
    h = jnp.tanh(state @ w1 + b1)
    h = jnp.tanh(h @ w2 + b2)
    h = jnp.tanh(h @ w3 + b3)
    return jax.nn.sigmoid(h @ w4 + b4).reshape(-1)


if __name__ == "__main__":
    # Small synthetic shapes consistent with the module's forward.
    stu_num, prob_num, know_num = 6, 5, 16
    emb_dim, batch = 32, 8

    key = jax.random.PRNGKey(0)
    k_z, k_sid, k_eid, k_kp, k_params = jax.random.split(key, 5)

    z = jax.random.normal(
        k_z, (stu_num + prob_num + know_num, emb_dim), dtype=jnp.float32)
    student_id = jax.random.randint(k_sid, (batch,), 0, stu_num)
    exercise_id = jax.random.randint(k_eid, (batch,), 0, prob_num)
    knowledge_point = jax.random.bernoulli(
        k_kp, 0.5, (batch, know_num)).astype(jnp.float32)

    params = init_positive_mlp_params(k_params, know_num)

    ref = _reference_forward(
        z, student_id, exercise_id, knowledge_point, params,
        stu_num=stu_num, prob_num=prob_num)

    # f32 compute path: exact semantics of the PyTorch module.
    out_f32 = simple_cd_decoder_forward(
        z, student_id, exercise_id, knowledge_point, params,
        stu_num=stu_num, prob_num=prob_num,
        compute_dtype=jnp.float32, transcendental_dtype=jnp.float32)
    out_f32 = jax.block_until_ready(out_f32)
    assert out_f32.shape == (batch,)
    assert jnp.allclose(out_f32, ref, atol=1e-5, rtol=1e-5), (out_f32, ref)

    # Default fast path: bf16 MXU inputs, f32 accumulation + f32 transcendentals.
    out_bf16 = simple_cd_decoder_forward(
        z, student_id, exercise_id, knowledge_point, params,
        stu_num=stu_num, prob_num=prob_num,
        compute_dtype=jnp.bfloat16, transcendental_dtype=jnp.float32)
    out_bf16 = jax.block_until_ready(out_bf16)
    assert out_bf16.shape == (batch,)
    assert jnp.allclose(out_bf16, ref, atol=3e-2), (out_bf16, ref)

    # EUP-light path for v6e/v7x: bf16 tanh inside the MLP (mastery sigmoid
    # difference stays f32 inside the kernel).
    out_fast = simple_cd_decoder_forward(
        z, student_id, exercise_id, knowledge_point, params,
        stu_num=stu_num, prob_num=prob_num,
        compute_dtype=jnp.bfloat16, transcendental_dtype=jnp.bfloat16)
    out_fast = jax.block_until_ready(out_fast)
    assert out_fast.shape == (batch,)
    assert jnp.allclose(out_fast, ref, atol=5e-2), (out_fast, ref)

    print("KERNEL_OK")
</pallas_src>

<mosaic_0001>
module attributes {stable_mosaic.version = 11 : i64} {
  func.func @_decoder_kernel(%arg0: i32, %arg1: memref<256x32xf32, #tpu.memory_space<vmem>>, %arg2: memref<128x128xf32, #tpu.memory_space<vmem>>, %arg3: memref<32x128xf32, #tpu.memory_space<vmem>>, %arg4: memref<128x512xf32, #tpu.memory_space<vmem>>, %arg5: memref<1x512xf32, #tpu.memory_space<vmem>>, %arg6: memref<512x256xf32, #tpu.memory_space<vmem>>, %arg7: memref<1x256xf32, #tpu.memory_space<vmem>>, %arg8: memref<256x128xf32, #tpu.memory_space<vmem>>, %arg9: memref<1x128xf32, #tpu.memory_space<vmem>>, %arg10: memref<1x128xf32, #tpu.memory_space<vmem>>, %arg11: memref<1x1xf32, #tpu.memory_space<vmem>>, %arg12: memref<1x128xf32, #tpu.memory_space<vmem>>) attributes {dimension_semantics = [#tpu.dimension_semantics<parallel>], iteration_bounds = array<i64: 1>, scalar_prefetch = 0 : i64, scratch_operands = 0 : i64, tpu.core_type = #tpu.core_type<tc>, window_params = [{transform_indices = @transform_0, window_bounds = array<i64: 256, 32>}, {transform_indices = @transform_1, window_bounds = array<i64: 128, 128>}, {pipeline_mode = #tpu.pipeline_mode<synchronous>, transform_indices = @transform_2, window_bounds = array<i64: 32, 128>}, {pipeline_mode = #tpu.pipeline_mode<synchronous>, transform_indices = @transform_3, window_bounds = array<i64: 128, 512>}, {pipeline_mode = #tpu.pipeline_mode<synchronous>, transform_indices = @transform_4, window_bounds = array<i64: 1, 512>}, {pipeline_mode = #tpu.pipeline_mode<synchronous>, transform_indices = @transform_5, window_bounds = array<i64: 512, 256>}, {pipeline_mode = #tpu.pipeline_mode<synchronous>, transform_indices = @transform_6, window_bounds = array<i64: 1, 256>}, {pipeline_mode = #tpu.pipeline_mode<synchronous>, transform_indices = @transform_7, window_bounds = array<i64: 256, 128>}, {pipeline_mode = #tpu.pipeline_mode<synchronous>, transform_indices = @transform_8, window_bounds = array<i64: 1, 128>}, {pipeline_mode = #tpu.pipeline_mode<synchronous>, transform_indices = @transform_9, window_bounds = array<i64: 1, 128>}, {pipeline_mode = #tpu.pipeline_mode<synchronous>, transform_indices = @transform_10, window_bounds = array<i64: 1, 1>}, {transform_indices = @transform_11, window_bounds = array<i64: 1, 128>}]} {
    %c0 = arith.constant 0 : index
    %c0_0 = arith.constant 0 : index
    %0 = vector.load %arg1[%c0, %c0_0] : memref<256x32xf32, #tpu.memory_space<vmem>>, vector<256x32xf32>
    %c0_1 = arith.constant 0 : index
    %c0_2 = arith.constant 0 : index
    %1 = vector.load %arg3[%c0_1, %c0_2] : memref<32x128xf32, #tpu.memory_space<vmem>>, vector<32x128xf32>
    %cst = arith.constant dense<0.000000e+00> : vector<256x128xf32>
    %2 = tpu.matmul %0, %1, %cst {dimension_numbers = #tpu.dot_dimension_numbers<[1], [0], [0], [1], [0, 0, 1, 1], [], []>} : vector<256x32xf32>, vector<32x128xf32>, vector<256x128xf32> -> vector<256x128xf32>
    %cst_3 = arith.constant 5.000000e-01 : f32
    %3 = vector.broadcast %cst_3 : f32 to vector<256x128xf32>
    %4 = arith.mulf %3, %2 : vector<256x128xf32>
    %5 = math.tanh %4 : vector<256x128xf32>
    %cst_4 = arith.constant 5.000000e-01 : f32
    %6 = vector.broadcast %cst_4 : f32 to vector<256x128xf32>
    %7 = arith.mulf %6, %5 : vector<256x128xf32>
    %cst_5 = arith.constant 5.000000e-01 : f32
    %8 = vector.broadcast %cst_5 : f32 to vector<256x128xf32>
    %9 = arith.addf %7, %8 : vector<256x128xf32>
    %c0_6 = arith.constant 0 : index
    %c0_7 = arith.constant 0 : index
    %10 = vector.load %arg2[%c0_6, %c0_7] : memref<128x128xf32, #tpu.memory_space<vmem>>, vector<128x128xf32>
    %11 = vector.extract_strided_slice %9 {offsets = [0, 0], sizes = [128, 128], strides = [1, 1]} : vector<256x128xf32> to vector<128x128xf32>
    %12 = vector.extract_strided_slice %9 {offsets = [128, 0], sizes = [128, 128], strides = [1, 1]} : vector<256x128xf32> to vector<128x128xf32>
    %13 = arith.subf %11, %12 : vector<128x128xf32>
    %14 = arith.mulf %10, %13 : vector<128x128xf32>
    %c0_8 = arith.constant 0 : index
    %c0_9 = arith.constant 0 : index
    %15 = vector.load %arg4[%c0_8, %c0_9] : memref<128x512xf32, #tpu.memory_space<vmem>>, vector<128x512xf32>
    %cst_10 = arith.constant dense<0.000000e+00> : vector<128x512xf32>
    %16 = tpu.matmul %14, %15, %cst_10 {dimension_numbers = #tpu.dot_dimension_numbers<[1], [0], [0], [1], [0, 0, 1, 1], [], []>} : vector<128x128xf32>, vector<128x512xf32>, vector<128x512xf32> -> vector<128x512xf32>
    %c0_11 = arith.constant 0 : index
    %c0_12 = arith.constant 0 : index
    %17 = vector.load %arg5[%c0_11, %c0_12] : memref<1x512xf32, #tpu.memory_space<vmem>>, vector<1x512xf32>
    %18 = vector.broadcast %17 : vector<1x512xf32> to vector<128x512xf32>
    %19 = arith.addf %16, %18 : vector<128x512xf32>
    %20 = math.tanh %19 : vector<128x512xf32>
    %c0_13 = arith.constant 0 : index
    %c0_14 = arith.constant 0 : index
    %21 = vector.load %arg6[%c0_13, %c0_14] : memref<512x256xf32, #tpu.memory_space<vmem>>, vector<512x256xf32>
    %cst_15 = arith.constant dense<0.000000e+00> : vector<128x256xf32>
    %22 = tpu.matmul %20, %21, %cst_15 {dimension_numbers = #tpu.dot_dimension_numbers<[1], [0], [0], [1], [0, 0, 1, 1], [], []>} : vector<128x512xf32>, vector<512x256xf32>, vector<128x256xf32> -> vector<128x256xf32>
    %c0_16 = arith.constant 0 : index
    %c0_17 = arith.constant 0 : index
    %23 = vector.load %arg7[%c0_16, %c0_17] : memref<1x256xf32, #tpu.memory_space<vmem>>, vector<1x256xf32>
    %24 = vector.broadcast %23 : vector<1x256xf32> to vector<128x256xf32>
    %25 = arith.addf %22, %24 : vector<128x256xf32>
    %26 = math.tanh %25 : vector<128x256xf32>
    %c0_18 = arith.constant 0 : index
    %c0_19 = arith.constant 0 : index
    %27 = vector.load %arg8[%c0_18, %c0_19] : memref<256x128xf32, #tpu.memory_space<vmem>>, vector<256x128xf32>
    %cst_20 = arith.constant dense<0.000000e+00> : vector<128x128xf32>
    %28 = tpu.matmul %26, %27, %cst_20 {dimension_numbers = #tpu.dot_dimension_numbers<[1], [0], [0], [1], [0, 0, 1, 1], [], []>} : vector<128x256xf32>, vector<256x128xf32>, vector<128x128xf32> -> vector<128x128xf32>
    %c0_21 = arith.constant 0 : index
    %c0_22 = arith.constant 0 : index
    %29 = vector.load %arg9[%c0_21, %c0_22] : memref<1x128xf32, #tpu.memory_space<vmem>>, vector<1x128xf32>
    %30 = vector.broadcast %29 : vector<1x128xf32> to vector<128x128xf32>
    %31 = arith.addf %28, %30 : vector<128x128xf32>
    %32 = math.tanh %31 : vector<128x128xf32>
    %c0_23 = arith.constant 0 : index
    %c0_24 = arith.constant 0 : index
    %33 = vector.load %arg10[%c0_23, %c0_24] : memref<1x128xf32, #tpu.memory_space<vmem>>, vector<1x128xf32>
    %cst_25 = arith.constant dense<0.000000e+00> : vector<1x128xf32>
    %34 = tpu.matmul %33, %32, %cst_25 {dimension_numbers = #tpu.dot_dimension_numbers<[1], [1], [0], [0], [0, 0, 1, 0], [], []>} : vector<1x128xf32>, vector<128x128xf32>, vector<1x128xf32> -> vector<1x128xf32>
    %c0_26 = arith.constant 0 : index
    %c0_27 = arith.constant 0 : index
    %35 = vector.load %arg11[%c0_26, %c0_27] : memref<1x1xf32, #tpu.memory_space<vmem>>, vector<1x1xf32>
    %36 = vector.broadcast %35 : vector<1x1xf32> to vector<1x128xf32>
    %37 = arith.addf %34, %36 : vector<1x128xf32>
    %cst_28 = arith.constant 5.000000e-01 : f32
    %38 = vector.broadcast %cst_28 : f32 to vector<1x128xf32>
    %39 = arith.mulf %38, %37 : vector<1x128xf32>
    %40 = math.tanh %39 : vector<1x128xf32>
    %cst_29 = arith.constant 5.000000e-01 : f32
    %41 = vector.broadcast %cst_29 : f32 to vector<1x128xf32>
    %42 = arith.mulf %41, %40 : vector<1x128xf32>
    %cst_30 = arith.constant 5.000000e-01 : f32
    %43 = vector.broadcast %cst_30 : f32 to vector<1x128xf32>
    %44 = arith.addf %42, %43 : vector<1x128xf32>
    %c0_31 = arith.constant 0 : index
    %c0_32 = arith.constant 0 : index
    %45 = vector.load %arg12[%c0_31, %c0_32] : memref<1x128xf32, #tpu.memory_space<vmem>>, vector<1x128xf32>
    tpu.vector_store %arg12[%c0_31, %c0_32], %44 {strides = array<i32>} : memref<1x128xf32, #tpu.memory_space<vmem>>, vector<1x128xf32>,
    return
  }
  func.func @transform_0(%arg0: i32) -> (i32, i32) {
    %c0_i32 = arith.constant 0 : i32
    %c0_i32_0 = arith.constant 0 : i32
    return %arg0, %c0_i32 : i32, i32
  }
  func.func @transform_1(%arg0: i32) -> (i32, i32) {
    %c0_i32 = arith.constant 0 : i32
    %c0_i32_0 = arith.constant 0 : i32
    return %arg0, %c0_i32 : i32, i32
  }
  func.func @transform_2(%arg0: i32) -> (i32, i32) {
    %c0_i32 = arith.constant 0 : i32
    %c0_i32_0 = arith.constant 0 : i32
    %c0_i32_1 = arith.constant 0 : i32
    return %c0_i32, %c0_i32_0 : i32, i32
  }
  func.func @transform_3(%arg0: i32) -> (i32, i32) {
    %c0_i32 = arith.constant 0 : i32
    %c0_i32_0 = arith.constant 0 : i32
    %c0_i32_1 = arith.constant 0 : i32
    return %c0_i32, %c0_i32_0 : i32, i32
  }
  func.func @transform_4(%arg0: i32) -> (i32, i32) {
    %c0_i32 = arith.constant 0 : i32
    %c0_i32_0 = arith.constant 0 : i32
    %c0_i32_1 = arith.constant 0 : i32
    return %c0_i32, %c0_i32_0 : i32, i32
  }
  func.func @transform_5(%arg0: i32) -> (i32, i32) {
    %c0_i32 = arith.constant 0 : i32
    %c0_i32_0 = arith.constant 0 : i32
    %c0_i32_1 = arith.constant 0 : i32
    return %c0_i32, %c0_i32_0 : i32, i32
  }
  func.func @transform_6(%arg0: i32) -> (i32, i32) {
    %c0_i32 = arith.constant 0 : i32
    %c0_i32_0 = arith.constant 0 : i32
    %c0_i32_1 = arith.constant 0 : i32
    return %c0_i32, %c0_i32_0 : i32, i32
  }
  func.func @transform_7(%arg0: i32) -> (i32, i32) {
    %c0_i32 = arith.constant 0 : i32
    %c0_i32_0 = arith.constant 0 : i32
    %c0_i32_1 = arith.constant 0 : i32
    return %c0_i32, %c0_i32_0 : i32, i32
  }
  func.func @transform_8(%arg0: i32) -> (i32, i32) {
    %c0_i32 = arith.constant 0 : i32
    %c0_i32_0 = arith.constant 0 : i32
    %c0_i32_1 = arith.constant 0 : i32
    return %c0_i32, %c0_i32_0 : i32, i32
  }
  func.func @transform_9(%arg0: i32) -> (i32, i32) {
    %c0_i32 = arith.constant 0 : i32
    %c0_i32_0 = arith.constant 0 : i32
    %c0_i32_1 = arith.constant 0 : i32
    return %c0_i32, %c0_i32_0 : i32, i32
  }
  func.func @transform_10(%arg0: i32) -> (i32, i32) {
    %c0_i32 = arith.constant 0 : i32
    %c0_i32_0 = arith.constant 0 : i32
    %c0_i32_1 = arith.constant 0 : i32
    return %c0_i32, %c0_i32_0 : i32, i32
  }
  func.func @transform_11(%arg0: i32) -> (i32, i32) {
    %c0_i32 = arith.constant 0 : i32
    %c0_i32_0 = arith.constant 0 : i32
    return %c0_i32, %arg0 : i32, i32
  }
}

</mosaic_0001>

<bundles_post_ra>
// kernel: tpu_custom_call.1
= control target key start
LH: loop header
LB: loop body
LE: loop exit
PB: predicated region body
PF: predicated region fallthrough
CT: control target
= control target key end

     0   :  { %s3724_s0 = inlined_call_operand.vmem [shape: f32[256,32], index: 0, kind: input, shape index: {}]   ;;  %s3725_s1 = inlined_call_operand.hbm [shape: f32[128,128], index: 1, kind: input, shape index: {}]   ;;  %s3726_s2 = inlined_call_operand.vmem [shape: f32[32,128], index: 2, kind: input, shape index: {}]   ;;  %s3727_s3 = inlined_call_operand.hbm [shape: f32[128,512], index: 3, kind: input, shape index: {}]   ;;  %s3728_s4 = inlined_call_operand.vmem [shape: f32[1,512], index: 4, kind: input, shape index: {}]   ;;  %s3729_s5 = inlined_call_operand.hbm [shape: f32[512,256], index: 5, kind: input, shape index: {}]   ;;  %s3730_s6 = inlined_call_operand.vmem [shape: f32[1,256], index: 6, kind: input, shape index: {}]   ;;  %s3731_s7 = inlined_call_operand.vmem [shape: f32[256,128], index: 7, kind: input, shape index: {}]   ;;  %s3732_s8 = inlined_call_operand.vmem [shape: f32[1,128], index: 8, kind: input, shape index: {}]   ;;  %s3733_s9 = inlined_call_operand.vmem [shape: f32[1,128], index: 9, kind: input, shape index: {}]   ;;  %s3734_s10 = inlined_call_operand.<no memory space> [shape: f32[1,1], index: 10, kind: input, shape index: {}]   ;;  %s3735_s11 = inlined_call_operand.hbm [shape: f32[1,128], index: 11, kind: output, shape index: {}]  }
   0x1   :  { %v16_v0 = vstv %s3734_s10 }
   0x2   :  { %17 = vst [vmem:[#allocation2] sm:$0x1] %v16_v0 }
   0x3   :  { %18 = vsyncpa [#allocation4], 0 }
   0x4   :  { %19 = vsyncpa [#allocation7], 0 }
   0x5   :  { %20 = vsyncpa [#allocation5], 0  ;;  %s2860_s19 = smov [#allocation6]   ;;  %s2766_s23 = scalar_lea.hbm %s3727_s3, 8192 }
   0x6   :  { %s42_s20 = sshll.u32 %s2860_s19, 4  ;;  %p2767_p0 = scmp.ne.s32.totalorder %s3727_s3, %s2766_s23  ;;  %s43_s20 = int_to_ptr.vmem [resolvable:$true] %s42_s20 }
   0x7   :  { %p2770_p1 = scmp.lt.u32.totalorder %s2766_s23, %s3727_s3 }
   0x9   :  { %p2772_p2 = pnand %p2770_p1, %p2767_p0 }
   0xb   :  { %2775 = shalt.err (!%p2772_p2)
}
   0xc   :  { %s2776_s10 = scalar_lea.vmem %s43_s20, 8192  ;;  %p2781_p4 = scmp.lt.s32.totalorder %s43_s20, %s43_s20 }
   0xd   :  { %p2777_p3 = scmp.ne.s32.totalorder %s43_s20, %s2776_s10  ;;  %p2782_p5 = scmp.lt.s32.totalorder %s2776_s10, %s2776_s10 }
   0xf   :  { %p2783_p6 = por %p2782_p5, %p2781_p4 }
  0x11   :  { %p2784_p7 = pnand %p2783_p6, %p2777_p3 }
  0x13   :  { %2787 = shalt.err (!%p2784_p7)
}
  0x14   :  { %s2861_s28 = smov 512   ;;  %s2862_s29 = smov 32  }
  0x15   :  { %48 = dma.hbm_to_vmem [thread:$0]  %s3727_s3, 8192, %s43_s20, [#allocation7], %s2861_s28, %s2861_s28, %s2862_s29  }
  0x16   :  { %s2863_s13 = smov [#allocation3]   ;;  %s2788_s17 = scalar_lea.hbm %s3725_s1, 2048 }
  0x17   :  { %s28_s14 = sshll.u32 %s2863_s13, 4  ;;  %p2789_p8 = scmp.ne.s32.totalorder %s3725_s1, %s2788_s17  ;;  %s29_s14 = int_to_ptr.vmem [resolvable:$true] %s28_s14 }
  0x18   :  { %p2792_p9 = scmp.lt.u32.totalorder %s2788_s17, %s3725_s1 }
  0x1a   :  { %p2794_p10 = pnand %p2792_p9, %p2789_p8 }
  0x1c   :  { %2797 = shalt.err (!%p2794_p10)
}
  0x1d   :  { %s2798_s23 = scalar_lea.vmem %s29_s14, 2048  ;;  %p2803_p12 = scmp.lt.s32.totalorder %s29_s14, %s29_s14 }
  0x1e   :  { %p2799_p11 = scmp.ne.s32.totalorder %s29_s14, %s2798_s23  ;;  %p2804_p13 = scmp.lt.s32.totalorder %s2798_s23, %s2798_s23 }
  0x20   :  { %p2805_p0 = por %p2804_p13, %p2803_p12 }
  0x22   :  { %p2806_p1 = pnand %p2805_p0, %p2799_p11 }
  0x24   :  { %2809 = shalt.err (!%p2806_p1)
}
  0x25   :  { %s2864_s3 = smov 128   ;;  %s2865_s20 = smov 8  }
  0x26   :  { %34 = dma.hbm_to_vmem [thread:$0]  %s3725_s1, 2048, %s29_s14, [#allocation4], %s2864_s3, %s2864_s3, %s2865_s20  }
  0x27   :  { %s2866_s26 = smov [#allocation8]   ;;  %s2810_s29 = scalar_lea.hbm %s3729_s5, 16384 }
  0x28   :  { %s56_s27 = sshll.u32 %s2866_s26, 4  ;;  %p2811_p2 = scmp.ne.s32.totalorder %s3729_s5, %s2810_s29  ;;  %s57_s27 = int_to_ptr.vmem [resolvable:$true] %s56_s27 }
  0x29   :  { %p2814_p3 = scmp.lt.u32.totalorder %s2810_s29, %s3729_s5 }
  0x2b   :  { %p2816_p4 = pnand %p2814_p3, %p2811_p2 }
  0x2d   :  { %2819 = shalt.err (!%p2816_p4)
}
  0x2e   :  { %s2820_s16 = scalar_lea.vmem %s57_s27, 16384  ;;  %p2825_p6 = scmp.lt.s32.totalorder %s57_s27, %s57_s27 }
  0x2f   :  { %p2821_p5 = scmp.ne.s32.totalorder %s57_s27, %s2820_s16  ;;  %p2826_p7 = scmp.lt.s32.totalorder %s2820_s16, %s2820_s16 }
  0x31   :  { %p2827_p8 = por %p2826_p7, %p2825_p6 }
  0x33   :  { %p2828_p9 = pnand %p2827_p8, %p2821_p5 }
  0x35   :  { %2831 = shalt.err (!%p2828_p9)
}
  0x36   :  { %s2867_s1 = smov 256   ;;  %s2868_s14 = smov 16  }
  0x37   :  { %62 = dma.hbm_to_vmem [thread:$0]  %s3729_s5, 16384, %s57_s27, [#allocation7], %s2867_s1, %s2867_s1, %s2868_s14  }
  0x38   :  { %2854 = dma.done.wait [#allocation4], 2048  }
  0x39   :  { %2855 = vsyncadd [#allocation4], 4294965248 }
  0x3a   :  { %2856 = dma.done.wait [#allocation7], 24576  }
  0x3b   :  { %2857 = vsyncadd [#allocation7], 4294942720  ;;  %vm118_vm0 = vcmask 261120   ;;  %v114_v1 = vld [vmem:[%s3726_s2] sm:$0xff]  ;;  %v115_v2 = vld [vmem:[%s3726_s2 + $0x8] sm:$0xff]  ;;  %vm2871_vm1 = vmmov 0  }
  0x3c   :  { %v116_v3 = vld [vmem:[%s3726_s2 + $0x10] sm:$0xff]  ;;  %v2141_v4 = vpack.c.bf16 %v115_v2, %v114_v1  ;;  %v117_v5 = vld [vmem:[%s3726_s2 + $0x18] sm:$0xff]  ;;  %v82_v6 = vld [vmem:[%s3724_s0] sm:$0xff]  ;;  %s2873_s30 = smov [#allocation9]  }
  0x3d   :  { %v2145_v7 = vpack.c.bf16 %v117_v5, %v116_v3  ;;  %2058 = vmatprep.mubr.msk.f32.mxu0 %vm118_vm0, %v82_v6  ;;  %v83_v8 = vld [vmem:[%s3724_s0 + $0x8] sm:$0xff]  ;;  %v84_v9 = vld [vmem:[%s3724_s0 + $0x10] sm:$0xff]  ;;  %v85_v10 = vld [vmem:[%s3724_s0 + $0x18] sm:$0xff]  ;;  %s1874_s12 = sshll.u32 %s2873_s30, 4  ;;  %s1875_s12 = int_to_ptr.vmem [resolvable:$true] %s1874_s12 }
  0x3e   :  { %2142 = vmatprep.subr.bf16.mxu0 %v2141_v4  ;;  %v86_v11 = vld [vmem:[%s3724_s0 + $0x20] sm:$0xff]  ;;  %v87_v12 = vld [vmem:[%s3724_s0 + $0x28] sm:$0xff]  ;;  %v88_v13 = vld [vmem:[%s3724_s0 + $0x30] sm:$0xff]  ;;  %s2832_s13 = scalar_lea.vmem %s1875_s12, 16  ;;  %s2836_s15 = scalar_lea.vmem %s1875_s12, 32 }
  0x3f   :  { %2144 = vmatpush3.bf16.msra.mxu0 %v2141_v4  ;;  %v89_v14 = vld [vmem:[%s3724_s0 + $0x38] sm:$0xff]  ;;  %v90_v15 = vld [vmem:[%s3724_s0 + $0x40] sm:$0xff]  ;;  %v91_v16 = vld [vmem:[%s3724_s0 + $0x48] sm:$0xff]  ;;  %p2833_p10 = scmp.ne.s32.totalorder %s1875_s12, %s2832_s13  ;;  %p2837_p11 = scmp.lt.s32.totalorder %s1875_s12, %s1875_s12 }
  0x40   :  { %2146 = vmatprep.subr.bf16.mxu0 %v2145_v7  ;;  %v92_v17 = vld [vmem:[%s3724_s0 + $0x50] sm:$0xff]  ;;  %v93_v18 = vld [vmem:[%s3724_s0 + $0x58] sm:$0xff]  ;;  %v94_v19 = vld [vmem:[%s3724_s0 + $0x60] sm:$0xff]  ;;  %p2838_p12 = scmp.lt.s32.totalorder %s2836_s15, %s2832_s13 }
  0x41   :  { %v95_v20 = vld [vmem:[%s3724_s0 + $0x68] sm:$0xff]  ;;  %v96_v21 = vld [vmem:[%s3724_s0 + $0x70] sm:$0xff]  ;;  %v97_v22 = vld [vmem:[%s3724_s0 + $0x78] sm:$0xff] }
  0x42   :  { %v98_v23 = vld [vmem:[%s3724_s0 + $0x80] sm:$0xff]  ;;  %v99_v24 = vld [vmem:[%s3724_s0 + $0x88] sm:$0xff]  ;;  %v100_v25 = vld [vmem:[%s3724_s0 + $0x90] sm:$0xff]  ;;  %p2839_p13 = por %p2838_p12, %p2837_p11 }
  0x43   :  { %2148 = vmatpush3.bf16.msra.mxu0 %v2145_v7  ;;  %v101_v26 = vld [vmem:[%s3724_s0 + $0x98] sm:$0xff]  ;;  %v102_v27 = vld [vmem:[%s3724_s0 + $0xa0] sm:$0xff]  ;;  %v103_v28 = vld [vmem:[%s3724_s0 + $0xa8] sm:$0xff] }
  0x44   :  { %v104_v29 = vld [vmem:[%s3724_s0 + $0xb0] sm:$0xff]  ;;  %v105_v30 = vld [vmem:[%s3724_s0 + $0xb8] sm:$0xff]  ;;  %v106_v31 = vld [vmem:[%s3724_s0 + $0xc0] sm:$0xff]  ;;  %p2840_p0 = pnand %p2839_p13, %p2833_p10 }
  0x45   :  { %v107_v32 = vld [vmem:[%s3724_s0 + $0xc8] sm:$0xff]  ;;  %v108_v33 = vld [vmem:[%s3724_s0 + $0xd0] sm:$0xff]  ;;  %v109_v34 = vld [vmem:[%s3724_s0 + $0xd8] sm:$0xff] }
  0x46   :  { %2059 = vmatmul.mubr.msk.f32.vlgmr.msra.gmra.mrb[0].mxu0 %vm118_vm0, %v83_v8  ;;  %v110_v35 = vld [vmem:[%s3724_s0 + $0xe0] sm:$0xff]  ;;  %v111_v36 = vld [vmem:[%s3724_s0 + $0xe8] sm:$0xff]  ;;  %v112_v37 = vld [vmem:[%s3724_s0 + $0xf0] sm:$0xff] }
  0x47   :  { %2061 = vmatprep.mubr.msk.f32.mxu0 %vm118_vm0, %v84_v9  ;;  %v113_v38 = vld [vmem:[%s3724_s0 + $0xf8] sm:$0xff]  ;;  %v617_v39 = vld [vmem:[#allocation6 + $0x8] sm:$0xff]  ;;  %v616_v44 = vld [vmem:[#allocation6] sm:$0xff] }
  0x48   :  { %v621_v40 = vld [vmem:[#allocation6 + $0x28] sm:$0xff]  ;;  %v619_v41 = vld [vmem:[#allocation6 + $0x18] sm:$0xff]  ;;  %v620_v45 = vld [vmem:[#allocation6 + $0x20] sm:$0xff] }
  0x49   :  { %v2149_v42 = vpack.c.bf16 %v621_v40, %v617_v39  ;;  %v623_v43 = vld [vmem:[#allocation6 + $0x38] sm:$0xff]  ;;  %v2151_v47 = vpack.c.bf16 %v620_v45, %v616_v44  ;;  %v618_v48 = vld [vmem:[#allocation6 + $0x10] sm:$0xff]  ;;  %v625_v51 = vld [vmem:[#allocation6 + $0x48] sm:$0xff] }
  0x4a   :  { %2062 = vmatmul.mubr.msk.f32.gmra.mrb[2].mxu0 %vm118_vm0, %v85_v10  ;;  %v2181_v46 = vpack.c.bf16 %v623_v43, %v619_v41  ;;  %v622_v49 = vld [vmem:[#allocation6 + $0x30] sm:$0xff]  ;;  %v629_v52 = vld [vmem:[#allocation6 + $0x68] sm:$0xff]  ;;  %v627_v53 = vld [vmem:[#allocation6 + $0x58] sm:$0xff] }
  0x4b   :  { %2064 = vmatprep.mubr.msk.f32.mxu0 %vm118_vm0, %v86_v11  ;;  %2150 = vmatprep.subr.bf16.mxu1 %v2149_v42  ;;  %v2183_v50 = vpack.c.bf16 %v622_v49, %v618_v48  ;;  %v2153_v54 = vpack.c.bf16 %v629_v52, %v625_v51  ;;  %v631_v55 = vld [vmem:[#allocation6 + $0x78] sm:$0xff]  ;;  %v624_v56 = vld [vmem:[#allocation6 + $0x40] sm:$0xff]  ;;  %v626_v60 = vld [vmem:[#allocation6 + $0x50] sm:$0xff] }
  0x4c   :  { %2182 = vmatprep.subr.bf16.mxu0 %v2181_v46  ;;  %2152 = vmatpush1.bf16.msra.mxu1 %v2151_v47  ;;  %v628_v57 = vld [vmem:[#allocation6 + $0x60] sm:$0xff]  ;;  %v2185_v58 = vpack.c.bf16 %v631_v55, %v627_v53  ;;  %v630_v61 = vld [vmem:[#allocation6 + $0x70] sm:$0xff]  ;;  %v633_v63 = vld [vmem:[#allocation6 + $0x88] sm:$0xff] }
  0x4d   :  { %2184 = vmatpush1.bf16.msra.mxu0 %v2183_v50  ;;  %v2155_v59 = vpack.c.bf16 %v628_v57, %v624_v56  ;;  %2154 = vmatprep.subr.bf16.mxu1 %v2153_v54  ;;  %v2187_v62 = vpack.c.bf16 %v630_v61, %v626_v60  ;;  %v637_v0 = vld [vmem:[#allocation6 + $0xa8] sm:$0xff]  ;;  %v635_v1 = vld [vmem:[#allocation6 + $0x98] sm:$0xff]  ;;  %v632_v4 = vld [vmem:[#allocation6 + $0x80] sm:$0xff] }
  0x4e   :  { %2065 = vmatmul.mubr.msk.f32.gmra.mrb[4].mxu0 %vm118_vm0, %v87_v12  ;;  %2186 = vmatprep.subr.bf16.mxu0 %v2185_v58  ;;  %v2157_v2 = vpack.c.bf16 %v637_v0, %v633_v63  ;;  %v639_v3 = vld [vmem:[#allocation6 + $0xb8] sm:$0xff]  ;;  %v636_v5 = vld [vmem:[#allocation6 + $0xa0] sm:$0xff]  ;;  %v634_v8 = vld [vmem:[#allocation6 + $0x90] sm:$0xff] }
  0x4f   :  { %2067 = vmatprep.mubr.msk.f32.mxu0 %vm118_vm0, %v88_v13  ;;  %v2189_v6 = vpack.c.bf16 %v639_v3, %v635_v1  ;;  %v2159_v7 = vpack.c.bf16 %v636_v5, %v632_v4  ;;  %v638_v9 = vld [vmem:[#allocation6 + $0xb0] sm:$0xff]  ;;  %v641_v11 = vld [vmem:[#allocation6 + $0xc8] sm:$0xff]  ;;  %v643_v13 = vld [vmem:[#allocation6 + $0xd8] sm:$0xff] }
  0x50   :  { %2156 = vmatpush1.bf16.msra.mxu1 %v2155_v59  ;;  %v2191_v10 = vpack.c.bf16 %v638_v9, %v634_v8  ;;  %v645_v12 = vld [vmem:[#allocation6 + $0xe8] sm:$0xff]  ;;  %v663_v39 = vld [vmem:[#allocation6 + $0x178] sm:$0xff]  ;;  %v656_v40 = vld [vmem:[#allocation6 + $0x140] sm:$0xff] }
  0x51   :  { %2188 = vmatpush1.bf16.msra.mxu0 %v2187_v62  ;;  %2158 = vmatprep.subr.bf16.mxu1 %v2157_v2  ;;  %v660_v41 = vld [vmem:[#allocation6 + $0x160] sm:$0xff]  ;;  %v658_v44 = vld [vmem:[#allocation6 + $0x150] sm:$0xff]  ;;  %v665_v47 = vld [vmem:[#allocation6 + $0x188] sm:$0xff] }
  0x52   :  { %2068 = vmatmul.mubr.msk.f32.gmra.mrb[6].mxu0 %vm118_vm0, %v89_v14  ;;  %2190 = vmatprep.subr.bf16.mxu0 %v2189_v6  ;;  %v2161_v14 = vpack.c.bf16 %v645_v12, %v641_v11  ;;  %v2171_v43 = vpack.c.bf16 %v660_v41, %v656_v40  ;;  %v662_v45 = vld [vmem:[#allocation6 + $0x170] sm:$0xff]  ;;  %v669_v48 = vld [vmem:[#allocation6 + $0x1a8] sm:$0xff]  ;;  %v667_v49 = vld [vmem:[#allocation6 + $0x198] sm:$0xff] }
  0x53   :  { %2070 = vmatprep.mubr.msk.f32.mxu0 %vm118_vm0, %v90_v15  ;;  %v647_v15 = vld [vmem:[#allocation6 + $0xf8] sm:$0xff]  ;;  %v2203_v46 = vpack.c.bf16 %v662_v45, %v658_v44  ;;  %v2173_v50 = vpack.c.bf16 %v669_v48, %v665_v47  ;;  %v664_v52 = vld [vmem:[#allocation6 + $0x180] sm:$0xff]  ;;  %v666_v56 = vld [vmem:[#allocation6 + $0x190] sm:$0xff] }
  0x54   :  { %2160 = vmatpush1.bf16.msra.mxu1 %v2159_v7  ;;  %v671_v51 = vld [vmem:[#allocation6 + $0x1b8] sm:$0xff]  ;;  %v668_v53 = vld [vmem:[#allocation6 + $0x1a0] sm:$0xff]  ;;  %v670_v57 = vld [vmem:[#allocation6 + $0x1b0] sm:$0xff]  ;;  %v2869_v7 = vmov 0.0  }
  0x55   :  { %2192 = vmatpush1.bf16.msra.mxu0 %v2191_v10  ;;  %2162 = vmatprep.subr.bf16.mxu1 %v2161_v14  ;;  %v2205_v54 = vpack.c.bf16 %v671_v51, %v667_v49  ;;  %v2175_v55 = vpack.c.bf16 %v668_v53, %v664_v52  ;;  %v2207_v58 = vpack.c.bf16 %v670_v57, %v666_v56  ;;  %v673_v59 = vld [vmem:[#allocation6 + $0x1c8] sm:$0xff]  ;;  %v675_v61 = vld [vmem:[#allocation6 + $0x1d8] sm:$0xff]  ;;  %v672_v0 = vld [vmem:[#allocation6 + $0x1c0] sm:$0xff] }
  0x56   :  { %2071 = vmatmul.mubr.msk.f32.gmra.mrb[8].mxu0 %vm118_vm0, %v91_v16  ;;  %v640_v16 = vld [vmem:[#allocation6 + $0xc0] sm:$0xff]  ;;  %v677_v60 = vld [vmem:[#allocation6 + $0x1e8] sm:$0xff]  ;;  %v679_v63 = vld [vmem:[#allocation6 + $0x1f8] sm:$0xff]  ;;  %766 = vmatprep.mubr.f32.mxu1 %v2869_v7 }
  0x57   :  { %2073 = vmatprep.mubr.msk.f32.mxu0 %vm118_vm0, %v92_v17  ;;  %v644_v17 = vld [vmem:[#allocation6 + $0xe0] sm:$0xff]  ;;  %v2177_v62 = vpack.c.bf16 %v677_v60, %v673_v59  ;;  %v2209_v2 = vpack.c.bf16 %v679_v63, %v675_v61  ;;  %v674_v4 = vld [vmem:[#allocation6 + $0x1d0] sm:$0xff]  ;;  %v1089_v8 = vld [vmem:[#allocation8 + $0x8] sm:$0xff] }
  0x58   :  { %v676_v1 = vld [vmem:[#allocation6 + $0x1e0] sm:$0xff]  ;;  %v678_v5 = vld [vmem:[#allocation6 + $0x1f0] sm:$0xff]  ;;  %v1091_v9 = vld [vmem:[#allocation8 + $0x18] sm:$0xff] }
  0x59   :  { %v2179_v3 = vpack.c.bf16 %v676_v1, %v672_v0  ;;  %v2211_v6 = vpack.c.bf16 %v678_v5, %v674_v4  ;;  %v2213_v10 = vpack.c.bf16 %v1091_v9, %v1089_v8  ;;  %v3123_v45 = vld [vmem:[#allocation8] sm:$0xff]  ;;  %v3125_v47 = vld [vmem:[#allocation8 + $0x10] sm:$0xff]  ;;  %v3127_v48 = vld [vmem:[#allocation8 + $0x28] sm:$0xff] }
  0x5a   :  { %2074 = vmatmul.mubr.msk.f32.gmra.mrb[10].mxu0 %vm118_vm0, %v93_v18  ;;  %v2193_v18 = vpack.c.bf16 %v647_v15, %v643_v13  ;;  %v3129_v49 = vld [vmem:[#allocation8 + $0x38] sm:$0xff]  ;;  %v3131_v52 = vld [vmem:[#allocation8 + $0x20] sm:$0xff]  ;;  %v3133_v53 = vld [vmem:[#allocation8 + $0x30] sm:$0xff]  ;;  %v2215_v1 = vpack.c.bf16 %v3125_v47, %v3123_v45 }
  0x5b   :  { %2076 = vmatprep.mubr.msk.f32.mxu0 %vm118_vm0, %v94_v19  ;;  %v2163_v19 = vpack.c.bf16 %v644_v17, %v640_v16  ;;  %v3137_v59 = vld [vmem:[#allocation8 + $0x58] sm:$0xff]  ;;  %v3139_v60 = vld [vmem:[#allocation8 + $0x40] sm:$0xff]  ;;  %v3141_v61 = vld [vmem:[#allocation8 + $0x50] sm:$0xff]  ;;  %v2217_v4 = vpack.c.bf16 %v3129_v49, %v3127_v48  ;;  %v2219_v5 = vpack.c.bf16 %v3133_v53, %v3131_v52 }
  0x5c   :  { %2194 = vmatprep.subr.bf16.mxu0 %v2193_v18  ;;  %v1101_v47 = vld [vmem:[#allocation8 + $0x68] sm:$0xff] }
  0x5d   :  { %2164 = vmatpush1.bf16.msra.mxu1 %v2163_v19 }
  0x5e   :  { %2077 = vmatmul.mubr.msk.f32.gmra.mrb[12].mxu0 %vm118_vm0, %v95_v20  ;;  %v642_v20 = vld [vmem:[#allocation6 + $0xd0] sm:$0xff] }
  0x5f   :  { %2079 = vmatprep.mubr.msk.f32.mxu0 %vm118_vm0, %v96_v21  ;;  %v646_v21 = vld [vmem:[#allocation6 + $0xf0] sm:$0xff] }
  0x62   :  { %2080 = vmatmul.mubr.msk.f32.gmra.mrb[14].mxu0 %vm118_vm0, %v97_v22  ;;  %v2195_v22 = vpack.c.bf16 %v646_v21, %v642_v20 }
  0x63   :  { %2082 = vmatprep.mubr.msk.f32.mxu0 %vm118_vm0, %v98_v23  ;;  %v649_v23 = vld [vmem:[#allocation6 + $0x108] sm:$0xff] }
  0x64   :  { %2196 = vmatpush1.bf16.msra.mxu0 %v2195_v22 }
  0x66   :  { %2083 = vmatmul.mubr.msk.f32.gmra.mrb[16].mxu0 %vm118_vm0, %v99_v24  ;;  %v653_v24 = vld [vmem:[#allocation6 + $0x128] sm:$0xff] }
  0x67   :  { %2085 = vmatprep.mubr.msk.f32.mxu0 %vm118_vm0, %v100_v25  ;;  %v651_v25 = vld [vmem:[#allocation6 + $0x118] sm:$0xff] }
  0x6a   :  { %2086 = vmatmul.mubr.msk.f32.gmra.mrb[18].mxu0 %vm118_vm0, %v101_v26  ;;  %v2165_v26 = vpack.c.bf16 %v653_v24, %v649_v23 }
  0x6b   :  { %2088 = vmatprep.mubr.msk.f32.mxu0 %vm118_vm0, %v102_v27  ;;  %v655_v27 = vld [vmem:[#allocation6 + $0x138] sm:$0xff] }
  0x6c   :  { %2166 = vmatprep.subr.bf16.mxu1 %v2165_v26 }
  0x6e   :  { %2089 = vmatmul.mubr.msk.f32.gmra.mrb[20].mxu0 %vm118_vm0, %v103_v28  ;;  %v648_v28 = vld [vmem:[#allocation6 + $0x100] sm:$0xff] }
  0x6f   :  { %2091 = vmatprep.mubr.msk.f32.mxu0 %vm118_vm0, %v104_v29  ;;  %v652_v29 = vld [vmem:[#allocation6 + $0x120] sm:$0xff] }
  0x72   :  { %2092 = vmatmul.mubr.msk.f32.gmra.mrb[22].mxu0 %vm118_vm0, %v105_v30  ;;  %v2197_v30 = vpack.c.bf16 %v655_v27, %v651_v25 }
  0x73   :  { %2094 = vmatprep.mubr.msk.f32.mxu0 %vm118_vm0, %v106_v31  ;;  %v2167_v31 = vpack.c.bf16 %v652_v29, %v648_v28 }
  0x74   :  { %2198 = vmatprep.subr.bf16.mxu0 %v2197_v30 }
  0x75   :  { %2168 = vmatpush1.bf16.msra.mxu1 %v2167_v31 }
  0x76   :  { %2095 = vmatmul.mubr.msk.f32.gmra.mrb[24].mxu0 %vm118_vm0, %v107_v32  ;;  %v650_v32 = vld [vmem:[#allocation6 + $0x110] sm:$0xff] }
  0x77   :  { %2097 = vmatprep.mubr.msk.f32.mxu0 %vm118_vm0, %v108_v33  ;;  %v654_v33 = vld [vmem:[#allocation6 + $0x130] sm:$0xff] }
  0x7a   :  { %2098 = vmatmul.mubr.msk.f32.gmra.mrb[26].mxu0 %vm118_vm0, %v109_v34  ;;  %v2199_v34 = vpack.c.bf16 %v654_v33, %v650_v32 }
  0x7b   :  { %2100 = vmatprep.mubr.msk.f32.mxu0 %vm118_vm0, %v110_v35  ;;  %v657_v35 = vld [vmem:[#allocation6 + $0x148] sm:$0xff] }
  0x7c   :  { %2200 = vmatpush1.bf16.msra.mxu0 %v2199_v34 }
  0x7e   :  { %2101 = vmatmul.mubr.msk.f32.gmra.mrb[28].mxu0 %vm118_vm0, %v111_v36  ;;  %v661_v36 = vld [vmem:[#allocation6 + $0x168] sm:$0xff] }
  0x7f   :  { %2103 = vmatprep.mubr.msk.f32.mxu0 %vm118_vm0, %v112_v37  ;;  %v659_v37 = vld [vmem:[#allocation6 + $0x158] sm:$0xff] }
  0x80   :  { %v2201_v42 = vpack.c.bf16 %v663_v39, %v659_v37 }
  0x82   :  { %2104 = vmatmul.mubr.msk.f32.gmra.mrb[30].mxu0 %vm118_vm0, %v113_v38  ;;  %v2169_v38 = vpack.c.bf16 %v661_v36, %v657_v35  ;;  %2202 = vmatprep.subr.bf16.mxu0 %v2201_v42 }
  0x83   :  { %2204 = vmatpush1.bf16.msra.mxu0 %v2203_v46  ;;  %927 = vmatprep.mubr.f32.mxu0 %v2869_v7 }
  0x84   :  { %2170 = vmatprep.subr.bf16.mxu1 %v2169_v38  ;;  %2206 = vmatprep.subr.bf16.mxu0 %v2205_v54  ;;  %v3135_v54 = vld [vmem:[#allocation8 + $0x48] sm:$0xff] }
  0x85   :  { %2172 = vmatpush1.bf16.msra.mxu1 %v2171_v43 }
  0x86   :  { %2174 = vmatprep.subr.bf16.mxu1 %v2173_v50 }
  0x87   :  { %2208 = vmatpush1.bf16.msra.mxu0 %v2207_v58 }
  0x88   :  { %2210 = vmatprep.subr.bf16.mxu0 %v2209_v2 }
  0x89   :  { %2176 = vmatpush1.bf16.msra.mxu1 %v2175_v55 }
  0x8a   :  { %2178 = vmatprep.subr.bf16.mxu1 %v2177_v62 }
  0x8b   :  { %2212 = vmatpush1.bf16.msra.mxu0 %v2211_v6 }
  0x8d   :  { %2180 = vmatpush1.bf16.msra.mxu1 %v2179_v3 }
  0x8e   :  { %2214 = vmatprep.subr.bf16.mxu1 %v2213_v10  ;;  %v2221_v10 = vpack.c.bf16 %v3137_v59, %v3135_v54 }
 0x119   :  { %v2060_v11 = vpop.f32.mrb[0].mxu0 }
 0x11a   :  { %v281_v12 = vpop.f32.mrb[1].mxu0  ;;  %v441_v24 = vmul.f32 0.5, %v2060_v11  ;;  %v2223_v11 = vpack.c.bf16 %v3141_v61, %v3139_v60  ;;  %v1111_v60 = vld [vmem:[#allocation8 + $0xb8] sm:$0xff] }
 0x11b   :  { %v440_v26 = vmul.f32 0.5, %v281_v12 }
 0x11c   :  { %2476 = vtanh.f32 %v441_v24 }
 0x11d   :  { %v2063_v13 = vpop.f32.mrb[2].mxu0  ;;  %2478 = vtanh.f32 %v440_v26 }
 0x11e   :  { %v291_v14 = vpop.f32.mrb[3].mxu0  ;;  %v443_v27 = vmul.f32 0.5, %v2063_v13 }
 0x11f   :  { %v442_v28 = vmul.f32 0.5, %v291_v14 }
 0x120   :  { %2480 = vtanh.f32 %v443_v27 }
 0x121   :  { %v2066_v15 = vpop.f32.mrb[4].mxu0  ;;  %2482 = vtanh.f32 %v442_v28 }
 0x122   :  { %v301_v16 = vpop.f32.mrb[5].mxu0  ;;  %v445_v30 = vmul.f32 0.5, %v2066_v15 }
 0x123   :  { %v444_v32 = vmul.f32 0.5, %v301_v16 }
 0x124   :  { %2484 = vtanh.f32 %v445_v30 }
 0x125   :  { %v2069_v17 = vpop.f32.mrb[6].mxu0  ;;  %2486 = vtanh.f32 %v444_v32 }
 0x126   :  { %v311_v18 = vpop.f32.mrb[7].mxu0  ;;  %v447_v34 = vmul.f32 0.5, %v2069_v17  ;;  %v2477_v46 = vpop.eup %2476 }
 0x127   :  { %v446_v37 = vmul.f32 0.5, %v311_v18  ;;  %v2479_v50 = vpop.eup %2478  ;;  %v505_v3 = vmul.f32 0.5, %v2477_v46 }
 0x128   :  { %v504_v8 = vmul.f32 0.5, %v2479_v50 }
 0x129   :  { %v2072_v19 = vpop.f32.mrb[8].mxu0 }
 0x12a   :  { %v321_v20 = vpop.f32.mrb[9].mxu0  ;;  %v449_v40 = vmul.f32 0.5, %v2072_v19  ;;  %v2481_v55 = vpop.eup %2480  ;;  %v536_v28 = vadd.f32 0.5, %v504_v8 }
 0x12b   :  { %v448_v43 = vmul.f32 0.5, %v321_v20  ;;  %v2483_v62 = vpop.eup %2482  ;;  %v507_v13 = vmul.f32 0.5, %v2481_v55 }
 0x12c   :  { %v506_v24 = vmul.f32 0.5, %v2483_v62 }
 0x12d   :  { %v2075_v21 = vpop.f32.mrb[10].mxu0 }
 0x12e   :  { %v331_v22 = vpop.f32.mrb[11].mxu0  ;;  %v451_v56 = vmul.f32 0.5, %v2075_v21  ;;  %v2485_v2 = vpop.eup %2484 }
 0x12f   :  { %v450_v63 = vmul.f32 0.5, %v331_v22  ;;  %v2487_v6 = vpop.eup %2486  ;;  %v3155_v22 = vadd.f32 0.5, %v505_v3  ;;  %v509_v30 = vmul.f32 0.5, %v2485_v2 }
 0x130   :  { %v508_v55 = vmul.f32 0.5, %v2487_v6 }
 0x131   :  { %v3115_v23 = vpop.f32.mrb[12].mxu0 }
 0x132   :  { %v3117_v25 = vpop.f32.mrb[13].mxu0  ;;  %v453_v14 = vmul.f32 0.5, %v3115_v23 }
 0x133   :  { %v452_v18 = vmul.f32 0.5, %v3117_v25 }
 0x135   :  { %v3119_v29 = vpop.f32.mrb[14].mxu0 }
 0x136   :  { %v3121_v31 = vpop.f32.mrb[15].mxu0  ;;  %v455_v62 = vmul.f32 0.5, %v3119_v29 }
 0x139   :  { %v2084_v33 = vpop.f32.mrb[16].mxu0 }
 0x13a   :  { %v457_v35 = vmul.f32 0.5, %v2084_v33  ;;  %v361_v36 = vpop.f32.mrb[17].mxu0 }
 0x13b   :  { %v456_v38 = vmul.f32 0.5, %v361_v36 }
 0x13c   :  { %2488 = vtanh.f32 %v457_v35 }
 0x13d   :  { %2490 = vtanh.f32 %v456_v38  ;;  %v2087_v39 = vpop.f32.mrb[18].mxu0 }
 0x13e   :  { %2492 = vtanh.f32 %v447_v34  ;;  %v459_v41 = vmul.f32 0.5, %v2087_v39  ;;  %v371_v42 = vpop.f32.mrb[19].mxu0  ;;  %v3157_v34 = vadd.f32 0.5, %v507_v13 }
 0x13f   :  { %2494 = vtanh.f32 %v446_v37  ;;  %v458_v44 = vmul.f32 0.5, %v371_v42 }
 0x140   :  { %2496 = vtanh.f32 %v459_v41 }
 0x141   :  { %2498 = vtanh.f32 %v458_v44  ;;  %v2090_v51 = vpop.f32.mrb[20].mxu0 }
 0x142   :  { %2500 = vtanh.f32 %v449_v40  ;;  %v461_v57 = vmul.f32 0.5, %v2090_v51  ;;  %v381_v58 = vpop.f32.mrb[21].mxu0  ;;  %v568_v40 = vld [vmem:[#allocation3] sm:$0xff]  ;;  %v3164_v51 = vadd.f32 0.5, %v509_v30 }
 0x143   :  { %2502 = vtanh.f32 %v448_v43  ;;  %v460_v0 = vmul.f32 0.5, %v381_v58  ;;  %v3160_v43 = vadd.f32 0.5, %v506_v24 }
 0x144   :  { %2504 = vtanh.f32 %v461_v57 }
 0x145   :  { %2506 = vtanh.f32 %v460_v0  ;;  %v2093_v9 = vpop.f32.mrb[22].mxu0 }
 0x146   :  { %v2489_v12 = vpop.eup %2488  ;;  %2508 = vtanh.f32 %v451_v56  ;;  %v463_v15 = vmul.f32 0.5, %v2093_v9  ;;  %v391_v16 = vpop.f32.mrb[23].mxu0  ;;  %v454_v9 = vmul.f32 0.5, %v3121_v31 }
 0x147   :  { %v2491_v17 = vpop.eup %2490  ;;  %2510 = vtanh.f32 %v450_v63  ;;  %v521_v19 = vmul.f32 0.5, %v2489_v12  ;;  %v462_v20 = vmul.f32 0.5, %v391_v16 }
 0x148   :  { %v2493_v21 = vpop.eup %2492  ;;  %v520_v26 = vmul.f32 0.5, %v2491_v17  ;;  %2512 = vtanh.f32 %v463_v15 }
 0x149   :  { %v2495_v27 = vpop.eup %2494  ;;  %v553_v32 = vadd.f32 0.5, %v521_v19  ;;  %2514 = vtanh.f32 %v462_v20  ;;  %v2096_v23 = vpop.f32.mrb[24].mxu0  ;;  %v511_v16 = vmul.f32 0.5, %v2493_v21  ;;  %v3180_v19 = vadd.f32 0.5, %v508_v55 }
 0x14a   :  { %v2497_v33 = vpop.eup %2496  ;;  %2516 = vtanh.f32 %v453_v14  ;;  %v552_v35 = vadd.f32 0.5, %v520_v26  ;;  %v465_v25 = vmul.f32 0.5, %v2096_v23  ;;  %v401_v36 = vpop.f32.mrb[25].mxu0  ;;  %v569_v14 = vld [vmem:[#allocation3 + $0x8] sm:$0xff]  ;;  %v510_v31 = vmul.f32 0.5, %v2495_v27 }
 0x14b   :  { %v2499_v37 = vpop.eup %2498  ;;  %2518 = vtanh.f32 %v452_v18  ;;  %v523_v38 = vmul.f32 0.5, %v2497_v33  ;;  %v464_v39 = vmul.f32 0.5, %v401_v36  ;;  %v585_v41 = vsub.f32 %v3155_v22, %v553_v32  ;;  %v570_v33 = vld [vmem:[#allocation3 + $0x10] sm:$0xff] }
 0x14c   :  { %v2501_v42 = vpop.eup %2500  ;;  %v522_v44 = vmul.f32 0.5, %v2499_v37  ;;  %2520 = vtanh.f32 %v465_v25  ;;  %v584_v46 = vsub.f32 %v536_v28, %v552_v35  ;;  %v3198_v36 = vadd.f32 0.5, %v511_v16 }
 0x14d   :  { %v3162_v50 = vpop.eup %2502  ;;  %v3166_v56 = vadd.f32 0.5, %v523_v38  ;;  %2522 = vtanh.f32 %v464_v39  ;;  %v2099_v57 = vpop.f32.mrb[26].mxu0  ;;  %v601_v30 = vmul.f32 %v585_v41, %v569_v14  ;;  %v3204_v39 = vadd.f32 0.5, %v510_v31  ;;  %v1102_v41 = vld [vmem:[#allocation8 + $0x70] sm:$0xff] }
 0x14e   :  { %v2505_v58 = vpop.eup %2504  ;;  %v3169_v63 = vadd.f32 0.5, %v522_v44  ;;  %v467_v0 = vmul.f32 0.5, %v2099_v57  ;;  %v411_v2 = vpop.f32.mrb[27].mxu0  ;;  %v600_v3 = vmul.f32 %v584_v46, %v568_v40  ;;  %v513_v40 = vmul.f32 0.5, %v2501_v42 }
 0x14f   :  { %v2507_v8 = vpop.eup %2506  ;;  %v525_v12 = vmul.f32 0.5, %v2505_v58  ;;  %v466_v13 = vmul.f32 0.5, %v411_v2  ;;  %v587_v6 = vsub.f32 %v3157_v34, %v3166_v56  ;;  %v512_v44 = vmul.f32 0.5, %v3162_v50  ;;  %v1109_v56 = vld [vmem:[#allocation8 + $0xa8] sm:$0xff] }
 0x150   :  { %v3174_v15 = vpop.eup %2508  ;;  %v524_v17 = vmul.f32 0.5, %v2507_v8  ;;  %2524 = vtanh.f32 %v467_v0  ;;  %767 = vmatmul.mubr.f32.vlgmr.msra.gmra.mrb[0].mxu1 %v600_v3  ;;  %928 = vmatmul.mubr.f32.vlgmr.msra.gmra.mrb[32].mxu0 %v600_v3  ;;  %v586_v29 = vsub.f32 %v3160_v43, %v3169_v63  ;;  %v571_v0 = vld [vmem:[#allocation3 + $0x18] sm:$0xff] }
 0x151   :  { %v3178_v18 = vpop.eup %2510  ;;  %v3182_v20 = vadd.f32 0.5, %v525_v12  ;;  %2526 = vtanh.f32 %v466_v13  ;;  %v2102_v22 = vpop.f32.mrb[28].mxu0  ;;  %772 = vmatprep.mubr.f32.mxu1 %v2869_v7  ;;  %933 = vmatprep.mubr.f32.mxu0 %v2869_v7  ;;  %v1107_v8 = vld [vmem:[#allocation8 + $0x98] sm:$0xff]  ;;  %v515_v12 = vmul.f32 0.5, %v3174_v15  ;;  %v3233_v59 = vadd.f32 0.5, %v512_v44  ;;  %v1104_v15 = vld [vmem:[#allocation8 + $0x80] sm:$0xff] }
 0x152   :  { %v2513_v21 = vpop.eup %2512  ;;  %2528 = vtanh.f32 %v455_v62  ;;  %v3186_v24 = vadd.f32 0.5, %v524_v17  ;;  %v469_v26 = vmul.f32 0.5, %v2102_v22  ;;  %v421_v28 = vpop.f32.mrb[29].mxu0  ;;  %2216 = vmatpush1.bf16.msra.mxu1 %v2215_v1  ;;  %v1103_v1 = vld [vmem:[#allocation8 + $0x78] sm:$0xff]  ;;  %v602_v58 = vmul.f32 %v586_v29, %v570_v33  ;;  %v1106_v17 = vld [vmem:[#allocation8 + $0x90] sm:$0xff]  ;;  %v572_v22 = vld [vmem:[#allocation3 + $0x20] sm:$0xff] }
 0x153   :  { %v2515_v27 = vpop.eup %2514  ;;  %2530 = vtanh.f32 %v454_v9  ;;  %v527_v32 = vmul.f32 0.5, %v2513_v21  ;;  %v468_v23 = vmul.f32 0.5, %v421_v28  ;;  %v589_v35 = vsub.f32 %v3164_v51, %v3182_v20  ;;  %2218 = vmatprep.subr.bf16.mxu1 %v2217_v4  ;;  %v3210_v4 = vld [vmem:[#allocation8 + $0x60] sm:$0xff]  ;;  %v1119_v51 = vld [vmem:[#allocation8 + $0xf8] sm:$0xff] }
 0x154   :  { %v3196_v25 = vpop.eup %2516  ;;  %v526_v37 = vmul.f32 0.5, %v2515_v27  ;;  %2532 = vtanh.f32 %v469_v26  ;;  %773 = vmatmul.mubr.f32.gmra.mrb[2].mxu1 %v601_v30  ;;  %934 = vmatmul.mubr.f32.gmra.mrb[34].mxu0 %v601_v30  ;;  %v588_v45 = vsub.f32 %v3180_v19, %v3186_v24  ;;  %v2225_v50 = vpack.c.bf16 %v1103_v1, %v1101_v47  ;;  %v1110_v1 = vld [vmem:[#allocation8 + $0xb0] sm:$0xff]  ;;  %v1115_v19 = vld [vmem:[#allocation8 + $0xd8] sm:$0xff] }
 0x155   :  { %v3202_v38 = vpop.eup %2518  ;;  %v3206_v48 = vadd.f32 0.5, %v527_v32  ;;  %2534 = vtanh.f32 %v468_v23  ;;  %v2105_v49 = vpop.f32.mrb[30].mxu0  ;;  %778 = vmatprep.mubr.f32.mxu1 %v2869_v7  ;;  %939 = vmatprep.mubr.f32.mxu0 %v2869_v7  ;;  %v2227_v53 = vpack.c.bf16 %v1102_v41, %v3210_v4  ;;  %v3226_v9 = vadd.f32 0.5, %v513_v40  ;;  %v573_v4 = vld [vmem:[#allocation3 + $0x28] sm:$0xff] }
 0x156   :  { %v2521_v43 = vpop.eup %2520  ;;  %v3213_v46 = vadd.f32 0.5, %v526_v37  ;;  %v471_v55 = vmul.f32 0.5, %v2105_v49  ;;  %v431_v57 = vpop.f32.mrb[31].mxu0  ;;  %2220 = vmatpush1.bf16.msra.mxu1 %v2219_v5  ;;  %v1105_v5 = vld [vmem:[#allocation8 + $0x88] sm:$0xff]  ;;  %v603_v16 = vmul.f32 %v587_v6, %v571_v0  ;;  %v517_v6 = vmul.f32 0.5, %v3196_v25  ;;  %v1108_v25 = vld [vmem:[#allocation8 + $0xa0] sm:$0xff] }
 0x157   :  { %v2523_v42 = vpop.eup %2522  ;;  %v529_v62 = vmul.f32 0.5, %v2521_v43  ;;  %v470_v63 = vmul.f32 0.5, %v431_v57  ;;  %v591_v2 = vsub.f32 %v3198_v36, %v3206_v48  ;;  %2222 = vmatprep.subr.bf16.mxu1 %v2221_v10  ;;  %v514_v10 = vmul.f32 0.5, %v3178_v18 }
 0x158   :  { %v528_v3 = vmul.f32 0.5, %v2523_v42  ;;  %2536 = vtanh.f32 %v471_v55  ;;  %779 = vmatmul.mubr.f32.gmra.mrb[4].mxu1 %v602_v58  ;;  %940 = vmatmul.mubr.f32.gmra.mrb[36].mxu0 %v602_v58  ;;  %v590_v52 = vsub.f32 %v3204_v39, %v3213_v46  ;;  %v2229_v18 = vpack.c.bf16 %v1107_v8, %v1105_v5  ;;  %v1113_v55 = vld [vmem:[#allocation8 + $0xc8] sm:$0xff]  ;;  %v574_v5 = vld [vmem:[#allocation3 + $0x30] sm:$0xff] }
 0x159   :  { %v3229_v13 = vadd.f32 0.5, %v529_v62  ;;  %2538 = vtanh.f32 %v470_v63  ;;  %784 = vmatprep.mubr.f32.mxu1 %v2869_v7  ;;  %945 = vmatprep.mubr.f32.mxu0 %v2869_v7  ;;  %v2231_v27 = vpack.c.bf16 %v1106_v17, %v1104_v15  ;;  %v3255_v23 = vadd.f32 0.5, %v514_v10  ;;  %v1114_v10 = vld [vmem:[#allocation8 + $0xd0] sm:$0xff]  ;;  %v1117_v17 = vld [vmem:[#allocation8 + $0xe8] sm:$0xff] }
 0x15a   :  { %v2525_v54 = vpop.eup %2524  ;;  %v3236_v14 = vadd.f32 0.5, %v528_v3  ;;  %2224 = vmatpush1.bf16.msra.mxu1 %v2223_v11  ;;  %v3248_v11 = vadd.f32 0.5, %v515_v12  ;;  %v516_v33 = vmul.f32 0.5, %v3202_v38  ;;  %v604_v47 = vmul.f32 %v588_v45, %v572_v22 }
 0x15b   :  { %v2527_v29 = vpop.eup %2526  ;;  %v531_v31 = vmul.f32 0.5, %v2525_v54  ;;  %v593_v21 = vsub.f32 %v3226_v9, %v3229_v13  ;;  %2226 = vmatprep.subr.bf16.mxu1 %v2225_v50  ;;  %v2233_v43 = vpack.c.bf16 %v1111_v60, %v1109_v56  ;;  %v3267_v24 = vadd.f32 0.5, %v517_v6  ;;  %v1112_v54 = vld [vmem:[#allocation8 + $0xc0] sm:$0xff] }
 0x15c   :  { %v2529_v26 = vpop.eup %2528  ;;  %v530_v28 = vmul.f32 0.5, %v2527_v29  ;;  %785 = vmatmul.mubr.f32.gmra.mrb[6].mxu1 %v603_v16  ;;  %946 = vmatmul.mubr.f32.gmra.mrb[38].mxu0 %v603_v16  ;;  %v592_v34 = vsub.f32 %v3233_v59, %v3236_v14  ;;  %v2235_v58 = vpack.c.bf16 %v1110_v1, %v1108_v25  ;;  %v3273_v62 = vadd.f32 0.5, %v516_v33  ;;  %v1116_v60 = vld [vmem:[#allocation8 + $0xe0] sm:$0xff]  ;;  %v1122_v25 = vld [vmem:[#allocation8 + $0x110] sm:$0xff]  ;;  %v1125_v1 = vld [vmem:[#allocation8 + $0x128] sm:$0xff] }
 0x15d   :  { %v2531_v61 = vpop.eup %2530  ;;  %v3251_v30 = vadd.f32 0.5, %v531_v31  ;;  %790 = vmatprep.mubr.f32.mxu1 %v2869_v7  ;;  %951 = vmatprep.mubr.f32.mxu0 %v2869_v7  ;;  %v519_v45 = vmul.f32 0.5, %v2529_v26  ;;  %v605_v50 = vmul.f32 %v589_v35, %v573_v4  ;;  %v2237_v12 = vpack.c.bf16 %v1115_v19, %v1113_v55  ;;  %v575_v26 = vld [vmem:[#allocation3 + $0x38] sm:$0xff]  ;;  %v1124_v4 = vld [vmem:[#allocation8 + $0x120] sm:$0xff] }
 0x15e   :  { %v2533_v32 = vpop.eup %2532  ;;  %v3258_v37 = vadd.f32 0.5, %v530_v28  ;;  %2228 = vmatpush1.bf16.msra.mxu1 %v2227_v53  ;;  %v518_v63 = vmul.f32 0.5, %v2531_v61  ;;  %v606_v22 = vmul.f32 %v590_v52, %v574_v5  ;;  %v2241_v56 = vpack.c.bf16 %v1119_v51, %v1117_v17  ;;  %v1118_v61 = vld [vmem:[#allocation8 + $0xf0] sm:$0xff]  ;;  %v576_v52 = vld [vmem:[#allocation3 + $0x40] sm:$0xff]  ;;  %v1131_v55 = vld [vmem:[#allocation8 + $0x158] sm:$0xff] }
 0x15f   :  { %v2535_v40 = vpop.eup %2534  ;;  %v533_v49 = vmul.f32 0.5, %v2533_v32  ;;  %v595_v41 = vsub.f32 %v3248_v11, %v3251_v30  ;;  %2230 = vmatprep.subr.bf16.mxu1 %v2229_v18  ;;  %v3284_v20 = vadd.f32 0.5, %v519_v45  ;;  %v2239_v18 = vpack.c.bf16 %v1114_v10, %v1112_v54  ;;  %v1123_v32 = vld [vmem:[#allocation8 + $0x118] sm:$0xff]  ;;  %v1128_v45 = vld [vmem:[#allocation8 + $0x140] sm:$0xff]  ;;  %v582_v30 = vld [vmem:[#allocation3 + $0x70] sm:$0xff] }
 0x160   :  { %v532_v44 = vmul.f32 0.5, %v2535_v40  ;;  %791 = vmatmul.mubr.f32.gmra.mrb[8].mxu1 %v604_v47  ;;  %952 = vmatmul.mubr.f32.gmra.mrb[40].mxu0 %v604_v47  ;;  %v594_v38 = vsub.f32 %v3255_v23, %v3258_v37  ;;  %v3290_v29 = vadd.f32 0.5, %v518_v63  ;;  %v607_v39 = vmul.f32 %v591_v2, %v575_v26  ;;  %v1120_v47 = vld [vmem:[#allocation8 + $0x100] sm:$0xff]  ;;  %v1127_v40 = vld [vmem:[#allocation8 + $0x138] sm:$0xff]  ;;  %v577_v2 = vld [vmem:[#allocation3 + $0x48] sm:$0xff] }
 0x161   :  { %v3269_v57 = vadd.f32 0.5, %v533_v49  ;;  %796 = vmatprep.mubr.f32.mxu1 %v2869_v7  ;;  %957 = vmatprep.mubr.f32.mxu0 %v2869_v7  ;;  %v2243_v46 = vpack.c.bf16 %v1118_v61, %v1116_v60  ;;  %v608_v36 = vmul.f32 %v592_v34, %v576_v52  ;;  %v2247_v48 = vpack.c.bf16 %v1122_v25, %v1120_v47  ;;  %v578_v34 = vld [vmem:[#allocation3 + $0x50] sm:$0xff]  ;;  %v1135_v63 = vld [vmem:[#allocation8 + $0x178] sm:$0xff]  ;;  %v580_v37 = vld [vmem:[#allocation3 + $0x60] sm:$0xff] }
 0x162   :  { %v2537_v42 = vpop.eup %2536  ;;  %v3275_v0 = vadd.f32 0.5, %v532_v44  ;;  %2232 = vmatpush1.bf16.msra.mxu1 %v2231_v27  ;;  %v1121_v27 = vld [vmem:[#allocation8 + $0x108] sm:$0xff]  ;;  %v2249_v49 = vpack.c.bf16 %v1127_v40, %v1125_v1  ;;  %v609_v59 = vmul.f32 %v593_v21, %v577_v2  ;;  %v610_v9 = vmul.f32 %v594_v38, %v578_v34  ;;  %v579_v21 = vld [vmem:[#allocation3 + $0x58] sm:$0xff]  ;;  %v1136_v54 = vld [vmem:[#allocation8 + $0x180] sm:$0xff] }
 0x163   :  { %v2539_v3 = vpop.eup %2538  ;;  %v535_v53 = vmul.f32 0.5, %v2537_v42  ;;  %v597_v8 = vsub.f32 %v3267_v24, %v3269_v57  ;;  %2234 = vmatprep.subr.bf16.mxu1 %v2233_v43  ;;  %v2245_v33 = vpack.c.bf16 %v1123_v32, %v1121_v27  ;;  %v1126_v43 = vld [vmem:[#allocation8 + $0x130] sm:$0xff]  ;;  %v1129_v44 = vld [vmem:[#allocation8 + $0x148] sm:$0xff]  ;;  %v611_v5 = vmul.f32 %v595_v41, %v579_v21  ;;  %v1143_v17 = vld [vmem:[#allocation8 + $0x1b8] sm:$0xff] }
 0x164   :  { %v534_v16 = vmul.f32 0.5, %v2539_v3  ;;  %797 = vmatmul.mubr.f32.gmra.mrb[10].mxu1 %v605_v50  ;;  %958 = vmatmul.mubr.f32.gmra.mrb[42].mxu0 %v605_v50  ;;  %v596_v15 = vsub.f32 %v3273_v62, %v3275_v0  ;;  %v2251_v14 = vpack.c.bf16 %v1126_v43, %v1124_v4  ;;  %v2253_v19 = vpack.c.bf16 %v1131_v55, %v1129_v44  ;;  %v1133_v42 = vld [vmem:[#allocation8 + $0x168] sm:$0xff]  ;;  %v1132_v3 = vld [vmem:[#allocation8 + $0x160] sm:$0xff]  ;;  %v583_v62 = vld [vmem:[#allocation3 + $0x78] sm:$0xff] }
 0x165   :  { %v3286_v35 = vadd.f32 0.5, %v535_v53  ;;  %802 = vmatprep.mubr.f32.mxu1 %v2869_v7  ;;  %963 = vmatprep.mubr.f32.mxu0 %v2869_v7  ;;  %v2257_v50 = vpack.c.bf16 %v1135_v63, %v1133_v42  ;;  %v1134_v53 = vld [vmem:[#allocation8 + $0x170] sm:$0xff]  ;;  %v1137_v57 = vld [vmem:[#allocation8 + $0x188] sm:$0xff]  ;;  %v1139_v0 = vld [vmem:[#allocation8 + $0x198] sm:$0xff]  ;;  %v682_v47 = vlaneseq }
 0x166   :  { %v3292_v31 = vadd.f32 0.5, %v534_v16  ;;  %2236 = vmatpush1.bf16.msra.mxu1 %v2235_v58  ;;  %v1130_v58 = vld [vmem:[#allocation8 + $0x150] sm:$0xff]  ;;  %v2259_v23 = vpack.c.bf16 %v1134_v53, %v1132_v3  ;;  %v612_v38 = vmul.f32 %v596_v15, %v580_v37  ;;  %v1141_v15 = vld [vmem:[#allocation8 + $0x1a8] sm:$0xff]  ;;  %v1144_v26 = vld [vmem:[#allocation8 + $0x1c0] sm:$0xff] }
 0x167   :  { %v599_v28 = vsub.f32 %v3284_v20, %v3286_v35  ;;  %2238 = vmatprep.subr.bf16.mxu1 %v2237_v12  ;;  %v2255_v13 = vpack.c.bf16 %v1130_v58, %v1128_v45  ;;  %v581_v12 = vld [vmem:[#allocation3 + $0x68] sm:$0xff]  ;;  %v1138_v10 = vld [vmem:[#allocation8 + $0x190] sm:$0xff]  ;;  %v2265_v51 = vpack.c.bf16 %v1143_v17, %v1141_v15  ;;  %v1147_v35 = vld [vmem:[#allocation8 + $0x1d8] sm:$0xff]  ;;  %v3346_v25 = vshrl.u32 %v682_v47, 7 }
 0x168   :  { %803 = vmatmul.mubr.f32.gmra.mrb[12].mxu1 %v606_v22  ;;  %964 = vmatmul.mubr.f32.gmra.mrb[44].mxu0 %v606_v22  ;;  %v598_v6 = vsub.f32 %v3290_v29, %v3292_v31  ;;  %v613_v11 = vmul.f32 %v597_v8, %v581_v12  ;;  %v2261_v8 = vpack.c.bf16 %v1139_v0, %v1137_v57  ;;  %v1140_v29 = vld [vmem:[#allocation8 + $0x1a0] sm:$0xff]  ;;  %v1142_v31 = vld [vmem:[#allocation8 + $0x1b0] sm:$0xff]  ;;  %v1145_v20 = vld [vmem:[#allocation8 + $0x1c8] sm:$0xff] }
 0x169   :  { %808 = vmatprep.mubr.f32.mxu1 %v2869_v7  ;;  %969 = vmatprep.mubr.f32.mxu0 %v2869_v7  ;;  %v615_v24 = vmul.f32 %v599_v28, %v583_v62  ;;  %v2263_v16 = vpack.c.bf16 %v1138_v10, %v1136_v54  ;;  %v2267_v22 = vpack.c.bf16 %v1142_v31, %v1140_v29  ;;  %v1146_v28 = vld [vmem:[#allocation8 + $0x1d0] sm:$0xff]  ;;  %v1149_v60 = vld [vmem:[#allocation8 + $0x1e8] sm:$0xff]  ;;  %v1151_v61 = vld [vmem:[#allocation8 + $0x1f8] sm:$0xff]  ;;  %v3349_v1 = vsub.s32 0, %v3346_v25 }
 0x16a   :  { %2240 = vmatpush1.bf16.msra.mxu1 %v2239_v18  ;;  %v614_v41 = vmul.f32 %v598_v6, %v582_v30  ;;  %v2269_v18 = vpack.c.bf16 %v1147_v35, %v1145_v20  ;;  %v2273_v6 = vpack.c.bf16 %v1151_v61, %v1149_v60  ;;  %v1148_v27 = vld [vmem:[#allocation8 + $0x1e0] sm:$0xff]  ;;  %v1150_v32 = vld [vmem:[#allocation8 + $0x1f0] sm:$0xff]  ;;  %v1155_v52 = vld [vmem:[#allocation8 + $0x218] sm:$0xff]  ;;  %v688_v40 = vsub.s32 1, %v3346_v25 }
 0x16b   :  { %2242 = vmatprep.subr.bf16.mxu1 %v2241_v56  ;;  %v2271_v56 = vpack.c.bf16 %v1146_v28, %v1144_v26  ;;  %v1152_v53 = vld [vmem:[#allocation8 + $0x200] sm:$0xff]  ;;  %v1159_v12 = vld [vmem:[#allocation8 + $0x238] sm:$0xff]  ;;  %v3388_v30 = vld [vmem:[#allocation8 + $0x230] sm:$0xff] }
 0x16c   :  { %809 = vmatmul.mubr.f32.gmra.mrb[14].mxu1 %v607_v39  ;;  %970 = vmatmul.mubr.f32.gmra.mrb[46].mxu0 %v607_v39  ;;  %v2275_v39 = vpack.c.bf16 %v1150_v32, %v1148_v27  ;;  %v1598_v57 = vld [vmem:[%s3731_s7 + $0x80] sm:$0xff]  ;;  %v1599_v0 = vld [vmem:[%s3731_s7 + $0x88] sm:$0xff]  ;;  %v1600_v17 = vld [vmem:[%s3731_s7 + $0x90] sm:$0xff] }
 0x16d   :  { %814 = vmatprep.mubr.f32.mxu1 %v2869_v7  ;;  %975 = vmatprep.mubr.f32.mxu0 %v2869_v7  ;;  %v1583_v15 = vld [vmem:[%s3731_s7 + $0x8] sm:$0xff]  ;;  %v1584_v35 = vld [vmem:[%s3731_s7 + $0x10] sm:$0xff]  ;;  %v1602_v26 = vld [vmem:[%s3731_s7 + $0xa0] sm:$0xff] }
 0x16e   :  { %2244 = vmatpush1.bf16.msra.mxu1 %v2243_v46  ;;  %v1153_v46 = vld [vmem:[#allocation8 + $0x208] sm:$0xff] }
 0x16f   :  { %2246 = vmatprep.subr.bf16.mxu1 %v2245_v33  ;;  %v2277_v33 = vpack.c.bf16 %v1155_v52, %v1153_v46  ;;  %v1161_v61 = vld [vmem:[#allocation8 + $0x248] sm:$0xff]  ;;  %v1160_v52 = vld [vmem:[#allocation8 + $0x240] sm:$0xff] }
 0x170   :  { %815 = vmatmul.mubr.f32.gmra.mrb[16].mxu1 %v608_v36  ;;  %976 = vmatmul.mubr.f32.gmra.mrb[48].mxu0 %v608_v36  ;;  %v3355_v36 = vld [vmem:[%s3728_s4] sm:$0xf]  ;;  %v1603_v27 = vld [vmem:[%s3731_s7 + $0xa8] sm:$0xff] }
 0x171   :  { %820 = vmatprep.mubr.f32.mxu1 %v2869_v7  ;;  %981 = vmatprep.mubr.f32.mxu0 %v2869_v7  ;;  %v3364_v2 = vrot.slane %v3355_v36, %v688_v40 }
 0x172   :  { %2248 = vmatpush1.bf16.msra.mxu1 %v2247_v48  ;;  %v3359_v48 = vrot.slane %v3355_v36, %v3349_v1 }
 0x173   :  { %2250 = vmatprep.subr.bf16.mxu1 %v2249_v49 }
 0x174   :  { %821 = vmatmul.mubr.f32.gmra.mrb[18].mxu1 %v609_v59  ;;  %982 = vmatmul.mubr.f32.gmra.mrb[50].mxu0 %v609_v59 }
 0x175   :  { %826 = vmatprep.mubr.f32.mxu1 %v2869_v7  ;;  %987 = vmatprep.mubr.f32.mxu0 %v2869_v7 }
 0x176   :  { %2252 = vmatpush1.bf16.msra.mxu1 %v2251_v14 }
 0x177   :  { %2254 = vmatprep.subr.bf16.mxu1 %v2253_v19 }
 0x178   :  { %827 = vmatmul.mubr.f32.gmra.mrb[20].mxu1 %v610_v9  ;;  %988 = vmatmul.mubr.f32.gmra.mrb[52].mxu0 %v610_v9 }
 0x179   :  { %832 = vmatprep.mubr.f32.mxu1 %v2869_v7  ;;  %993 = vmatprep.mubr.f32.mxu0 %v2869_v7 }
 0x17a   :  { %2256 = vmatpush1.bf16.msra.mxu1 %v2255_v13 }
 0x17b   :  { %2258 = vmatprep.subr.bf16.mxu1 %v2257_v50 }
 0x17c   :  { %833 = vmatmul.mubr.f32.gmra.mrb[22].mxu1 %v611_v5  ;;  %994 = vmatmul.mubr.f32.gmra.mrb[54].mxu0 %v611_v5  ;;  %v1154_v5 = vld [vmem:[#allocation8 + $0x210] sm:$0xff] }
 0x17d   :  { %838 = vmatprep.mubr.f32.mxu1 %v2869_v7  ;;  %999 = vmatprep.mubr.f32.mxu0 %v2869_v7 }
 0x17e   :  { %2260 = vmatpush1.bf16.msra.mxu1 %v2259_v23  ;;  %v1157_v23 = vld [vmem:[#allocation8 + $0x228] sm:$0xff] }
 0x17f   :  { %2262 = vmatprep.subr.bf16.mxu1 %v2261_v8  ;;  %v1582_v8 = vld [vmem:[%s3731_s7] sm:$0xff]  ;;  %v2281_v31 = vpack.c.bf16 %v1159_v12, %v1157_v23 }
 0x180   :  { %839 = vmatmul.mubr.f32.gmra.mrb[24].mxu1 %v612_v38  ;;  %1000 = vmatmul.mubr.f32.gmra.mrb[56].mxu0 %v612_v38 }
 0x181   :  { %844 = vmatprep.mubr.f32.mxu1 %v2869_v7  ;;  %1005 = vmatprep.mubr.f32.mxu0 %v2869_v7 }
 0x182   :  { %2264 = vmatpush1.bf16.msra.mxu1 %v2263_v16  ;;  %v2341_v16 = vpack.c.bf16 %v1599_v0, %v1598_v57  ;;  %v1166_v57 = vld [vmem:[#allocation8 + $0x270] sm:$0xff] }
 0x183   :  { %2266 = vmatprep.subr.bf16.mxu1 %v2265_v51  ;;  %v1601_v51 = vld [vmem:[%s3731_s7 + $0x98] sm:$0xff] }
 0x184   :  { %845 = vmatmul.mubr.f32.gmra.mrb[26].mxu1 %v613_v11  ;;  %1006 = vmatmul.mubr.f32.gmra.mrb[58].mxu0 %v613_v11  ;;  %v3386_v11 = vld [vmem:[#allocation8 + $0x220] sm:$0xff]  ;;  %v2345_v20 = vpack.c.bf16 %v1601_v51, %v1600_v17 }
 0x185   :  { %850 = vmatprep.mubr.f32.mxu1 %v2869_v7  ;;  %1011 = vmatprep.mubr.f32.mxu0 %v2869_v7  ;;  %v2283_v46 = vpack.c.bf16 %v3388_v30, %v3386_v11  ;;  %v1164_v11 = vld [vmem:[#allocation8 + $0x260] sm:$0xff] }
 0x186   :  { %2268 = vmatpush1.bf16.msra.mxu1 %v2267_v22  ;;  %v2343_v22 = vpack.c.bf16 %v1583_v15, %v1582_v8  ;;  %2342 = vmatprep.subr.bf16.mxu0 %v2341_v16  ;;  %v1588_v8 = vld [vmem:[%s3731_s7 + $0x30] sm:$0xff]  ;;  %v1606_v15 = vld [vmem:[%s3731_s7 + $0xc0] sm:$0xff]  ;;  %v1607_v17 = vld [vmem:[%s3731_s7 + $0xc8] sm:$0xff] }
 0x187   :  { %2270 = vmatprep.subr.bf16.mxu1 %v2269_v18  ;;  %v1585_v18 = vld [vmem:[%s3731_s7 + $0x18] sm:$0xff] }
 0x188   :  { %851 = vmatmul.mubr.f32.gmra.mrb[28].mxu1 %v614_v41  ;;  %1012 = vmatmul.mubr.f32.gmra.mrb[60].mxu0 %v614_v41 }
 0x189   :  { %856 = vmatprep.mubr.f32.mxu1 %v2869_v7  ;;  %1017 = vmatprep.mubr.f32.mxu0 %v2869_v7 }
 0x18a   :  { %2272 = vmatpush1.bf16.msra.mxu1 %v2271_v56  ;;  %2344 = vmatpush3.bf16.msra.mxu0 %v2343_v22  ;;  %v1169_v22 = vld [vmem:[#allocation8 + $0x288] sm:$0xff] }
 0x18b   :  { %2274 = vmatprep.subr.bf16.mxu1 %v2273_v6  ;;  %v1163_v6 = vld [vmem:[#allocation8 + $0x258] sm:$0xff]  ;;  %2346 = vmatprep.subr.bf16.mxu0 %v2345_v20 }
 0x18c   :  { %857 = vmatmul.mubr.f32.gmra.mrb[30].mxu1 %v615_v24  ;;  %1018 = vmatmul.mubr.f32.gmra.mrb[62].mxu0 %v615_v24  ;;  %v2279_v24 = vpack.c.bf16 %v1154_v5, %v1152_v53  ;;  %v1165_v53 = vld [vmem:[#allocation8 + $0x268] sm:$0xff]  ;;  %v1167_v5 = vld [vmem:[#allocation8 + $0x278] sm:$0xff] }
 0x18d   :  { %v2289_v16 = vpack.c.bf16 %v1167_v5, %v1165_v53  ;;  %v1171_v20 = vld [vmem:[#allocation8 + $0x298] sm:$0xff] }
 0x18e   :  { %2276 = vmatpush1.bf16.msra.mxu1 %v2275_v39 }
 0x18f   :  { %2278 = vmatprep.subr.bf16.mxu1 %v2277_v33  ;;  %v2347_v33 = vpack.c.bf16 %v1585_v18, %v1584_v35 }
 0x191   :  { %2348 = vmatpush3.bf16.msra.mxu0 %v2347_v33 }
 0x223   :  { %v768_v49 = vpop.f32.mrb[0].mxu1  ;;  %v3366_v4 = vpop.f32.mrb[32].mxu0 }
 0x224   :  { %v770_v43 = vpop.f32.mrb[1].mxu1  ;;  %v3368_v44 = vpop.f32.mrb[33].mxu0  ;;  %v769_v55 = vadd.f32 %v768_v49, %v3359_v48 }
 0x225   :  { %v771_v59 = vadd.f32 %v770_v43, %v3364_v2  ;;  %v1162_v43 = vld [vmem:[#allocation8 + $0x250] sm:$0xff] }
 0x226   :  { %v2287_v12 = vpack.c.bf16 %v1162_v43, %v1160_v52  ;;  %v1591_v52 = vld [vmem:[%s3731_s7 + $0x48] sm:$0xff]  ;;  %v1609_v43 = vld [vmem:[%s3731_s7 + $0xd8] sm:$0xff] }
 0x227   :  { %v774_v14 = vpop.f32.mrb[2].mxu1  ;;  %v3372_v34 = vpop.f32.mrb[34].mxu0  ;;  %2540 = vtanh.f32 %v771_v59  ;;  %v1586_v59 = vld [vmem:[%s3731_s7 + $0x20] sm:$0xff] }
 0x228   :  { %v776_v19 = vpop.f32.mrb[3].mxu1  ;;  %v3374_v45 = vpop.f32.mrb[35].mxu0  ;;  %2542 = vtanh.f32 %v769_v55  ;;  %v775_v58 = vadd.f32 %v774_v14, %v3359_v48  ;;  %v2349_v55 = vpack.c.bf16 %v1603_v27, %v1602_v26  ;;  %v1587_v14 = vld [vmem:[%s3731_s7 + $0x28] sm:$0xff]  ;;  %v2291_v26 = vpack.c.bf16 %v1166_v57, %v1164_v11  ;;  %v1170_v27 = vld [vmem:[#allocation8 + $0x290] sm:$0xff] }
 0x229   :  { %v777_v42 = vadd.f32 %v776_v19, %v3364_v2  ;;  %v2351_v30 = vpack.c.bf16 %v1587_v14, %v1586_v59  ;;  %v1593_v11 = vld [vmem:[%s3731_s7 + $0x58] sm:$0xff] }
 0x22a   :  { %2350 = vmatprep.subr.bf16.mxu0 %v2349_v55  ;;  %v1174_v57 = vld [vmem:[#allocation8 + $0x2b0] sm:$0xff] }
 0x22b   :  { %v780_v63 = vpop.f32.mrb[4].mxu1  ;;  %v3378_v9 = vpop.f32.mrb[36].mxu0  ;;  %2544 = vtanh.f32 %v777_v42  ;;  %v1604_v42 = vld [vmem:[%s3731_s7 + $0xb0] sm:$0xff]  ;;  %2352 = vmatpush3.bf16.msra.mxu0 %v2351_v30 }
 0x22c   :  { %v782_v13 = vpop.f32.mrb[5].mxu1  ;;  %v3380_v21 = vpop.f32.mrb[37].mxu0  ;;  %2546 = vtanh.f32 %v775_v58  ;;  %v781_v50 = vadd.f32 %v780_v63, %v3359_v48  ;;  %v2285_v58 = vpack.c.bf16 %v1163_v6, %v1161_v61  ;;  %v1605_v63 = vld [vmem:[%s3731_s7 + $0xb8] sm:$0xff] }
 0x22d   :  { %v783_v3 = vadd.f32 %v782_v13, %v3364_v2  ;;  %v2353_v0 = vpack.c.bf16 %v1605_v63, %v1604_v42 }
 0x22f   :  { %v786_v37 = vpop.f32.mrb[6].mxu1  ;;  %v3384_v38 = vpop.f32.mrb[38].mxu0  ;;  %2548 = vtanh.f32 %v783_v3  ;;  %2354 = vmatprep.subr.bf16.mxu0 %v2353_v0 }
 0x230   :  { %v788_v41 = vpop.f32.mrb[7].mxu1  ;;  %v3390_v62 = vpop.f32.mrb[39].mxu0  ;;  %2550 = vtanh.f32 %v781_v50  ;;  %v787_v54 = vadd.f32 %v786_v37, %v3359_v48 }
 0x231   :  { %v789_v10 = vadd.f32 %v788_v41, %v3364_v2  ;;  %v2541_v29 = vpop.eup %2540 }
 0x232   :  { %v2543_v28 = vpop.eup %2542  ;;  %1292 = vmatprep.mubr.f32.mxu1 %v2541_v29 }
 0x233   :  { %v792_v56 = vpop.f32.mrb[8].mxu1  ;;  %v3421_v60 = vpop.f32.mrb[40].mxu0  ;;  %2552 = vtanh.f32 %v789_v10  ;;  %1293 = vmatmul.mubr.f32.vlgmr.msra.gmra.mrb[32].mxu1 %v2543_v28  ;;  %v1168_v28 = vld [vmem:[#allocation8 + $0x280] sm:$0xff] }
 0x234   :  { %v794_v32 = vpop.f32.mrb[9].mxu1  ;;  %v3426_v39 = vpop.f32.mrb[41].mxu0  ;;  %2554 = vtanh.f32 %v787_v54  ;;  %v793_v47 = vadd.f32 %v792_v56, %v3359_v48  ;;  %2280 = vmatpush1.bf16.msra.mxu1 %v2279_v24  ;;  %v1589_v54 = vld [vmem:[%s3731_s7 + $0x38] sm:$0xff] }
 0x235   :  { %v795_v49 = vadd.f32 %v794_v32, %v3364_v2  ;;  %v2545_v19 = vpop.eup %2544  ;;  %2282 = vmatprep.subr.bf16.mxu1 %v2281_v31  ;;  %v2355_v56 = vpack.c.bf16 %v1589_v54, %v1588_v8  ;;  %v2357_v32 = vpack.c.bf16 %v1607_v17, %v1606_v15 }
 0x236   :  { %v2547_v13 = vpop.eup %2546  ;;  %1298 = vmatprep.mubr.f32.mxu1 %v2545_v19  ;;  %v1173_v19 = vld [vmem:[#allocation8 + $0x2a8] sm:$0xff] }
 0x237   :  { %v798_v50 = vpop.f32.mrb[10].mxu1  ;;  %v3444_v3 = vpop.f32.mrb[42].mxu0  ;;  %2556 = vtanh.f32 %v795_v49  ;;  %1299 = vmatmul.mubr.f32.gmra.mrb[34].mxu1 %v2547_v13  ;;  %v1608_v49 = vld [vmem:[%s3731_s7 + $0xd0] sm:$0xff]  ;;  %v2295_v13 = vpack.c.bf16 %v1170_v27, %v1168_v28  ;;  %2356 = vmatpush3.bf16.msra.mxu0 %v2355_v56  ;;  %v1176_v28 = vld [vmem:[#allocation8 + $0x2c0] sm:$0xff] }
 0x238   :  { %v800_v23 = vpop.f32.mrb[11].mxu1  ;;  %v3446_v37 = vpop.f32.mrb[43].mxu0  ;;  %2558 = vtanh.f32 %v793_v47  ;;  %v799_v41 = vadd.f32 %v798_v50, %v3359_v48  ;;  %2284 = vmatpush1.bf16.msra.mxu1 %v2283_v46  ;;  %v1590_v46 = vld [vmem:[%s3731_s7 + $0x40] sm:$0xff]  ;;  %v2293_v47 = vpack.c.bf16 %v1171_v20, %v1169_v22  ;;  %2358 = vmatprep.subr.bf16.mxu0 %v2357_v32  ;;  %v1178_v56 = vld [vmem:[#allocation8 + $0x2d0] sm:$0xff]  ;;  %v1181_v32 = vld [vmem:[#allocation8 + $0x2e8] sm:$0xff] }
 0x239   :  { %v801_v24 = vadd.f32 %v800_v23, %v3364_v2  ;;  %v2549_v10 = vpop.eup %2548  ;;  %2286 = vmatprep.subr.bf16.mxu1 %v2285_v58  ;;  %v1175_v58 = vld [vmem:[#allocation8 + $0x2b8] sm:$0xff]  ;;  %v2359_v50 = vpack.c.bf16 %v1591_v52, %v1590_v46  ;;  %v2361_v23 = vpack.c.bf16 %v1609_v43, %v1608_v49  ;;  %v2303_v43 = vpack.c.bf16 %v1178_v56, %v1176_v28 }
 0x23a   :  { %v2551_v51 = vpop.eup %2550  ;;  %1304 = vmatprep.mubr.f32.mxu1 %v2549_v10  ;;  %v1177_v10 = vld [vmem:[#allocation8 + $0x2c8] sm:$0xff]  ;;  %v1183_v46 = vld [vmem:[#allocation8 + $0x2f8] sm:$0xff] }
 0x23b   :  { %v804_v29 = vpop.f32.mrb[12].mxu1  ;;  %v3462_v31 = vpop.f32.mrb[44].mxu0  ;;  %2560 = vtanh.f32 %v801_v24  ;;  %1305 = vmatmul.mubr.f32.gmra.mrb[36].mxu1 %v2551_v51  ;;  %v1172_v24 = vld [vmem:[#allocation8 + $0x2a0] sm:$0xff]  ;;  %2360 = vmatpush3.bf16.msra.mxu0 %v2359_v50 }
 0x23c   :  { %v806_v35 = vpop.f32.mrb[13].mxu1  ;;  %v3464_v18 = vpop.f32.mrb[45].mxu0  ;;  %2562 = vtanh.f32 %v799_v41  ;;  %v805_v61 = vadd.f32 %v804_v29, %v3359_v48  ;;  %2288 = vmatpush1.bf16.msra.mxu1 %v2287_v12  ;;  %v1592_v12 = vld [vmem:[%s3731_s7 + $0x50] sm:$0xff]  ;;  %v2297_v41 = vpack.c.bf16 %v1175_v58, %v1173_v19  ;;  %v2299_v20 = vpack.c.bf16 %v1174_v57, %v1172_v24  ;;  %2362 = vmatprep.subr.bf16.mxu0 %v2361_v23  ;;  %v1180_v19 = vld [vmem:[#allocation8 + $0x2e0] sm:$0xff] }
 0x23d   :  { %v807_v6 = vadd.f32 %v806_v35, %v3364_v2  ;;  %v2553_v33 = vpop.eup %2552  ;;  %2290 = vmatprep.subr.bf16.mxu1 %v2289_v16  ;;  %v1179_v16 = vld [vmem:[#allocation8 + $0x2d8] sm:$0xff]  ;;  %v2363_v51 = vpack.c.bf16 %v1593_v11, %v1592_v12  ;;  %v1182_v58 = vld [vmem:[#allocation8 + $0x2f0] sm:$0xff] }
 0x23e   :  { %v2555_v55 = vpop.eup %2554  ;;  %1310 = vmatprep.mubr.f32.mxu1 %v2553_v33 }
 0x23f   :  { %v810_v59 = vpop.f32.mrb[14].mxu1  ;;  %v3480_v14 = vpop.f32.mrb[46].mxu0  ;;  %2564 = vtanh.f32 %v807_v6  ;;  %1311 = vmatmul.mubr.f32.gmra.mrb[38].mxu1 %v2555_v55  ;;  %2364 = vmatpush3.bf16.msra.mxu0 %v2363_v51  ;;  %v1189_v51 = vld [vmem:[#allocation8 + $0x328] sm:$0xff] }
 0x240   :  { %v812_v42 = vpop.f32.mrb[15].mxu1  ;;  %v3482_v63 = vpop.f32.mrb[47].mxu0  ;;  %2566 = vtanh.f32 %v805_v61  ;;  %v811_v53 = vadd.f32 %v810_v59, %v3359_v48  ;;  %2292 = vmatpush1.bf16.msra.mxu1 %v2291_v26  ;;  %v2301_v26 = vpack.c.bf16 %v1179_v16, %v1177_v10  ;;  %v2305_v59 = vpack.c.bf16 %v1183_v46, %v1181_v32  ;;  %v1190_v32 = vld [vmem:[#allocation8 + $0x330] sm:$0xff] }
 0x241   :  { %v813_v5 = vadd.f32 %v812_v42, %v3364_v2  ;;  %v2557_v30 = vpop.eup %2556  ;;  %2294 = vmatprep.subr.bf16.mxu1 %v2293_v47 }
 0x242   :  { %v2559_v0 = vpop.eup %2558  ;;  %1316 = vmatprep.mubr.f32.mxu1 %v2557_v30 }
 0x243   :  { %v816_v8 = vpop.f32.mrb[16].mxu1  ;;  %v3492_v54 = vpop.f32.mrb[48].mxu0  ;;  %2568 = vtanh.f32 %v813_v5  ;;  %1317 = vmatmul.mubr.f32.gmra.mrb[40].mxu1 %v2559_v0  ;;  %v1187_v5 = vld [vmem:[#allocation8 + $0x318] sm:$0xff]  ;;  %v1184_v0 = vld [vmem:[#allocation8 + $0x300] sm:$0xff] }
 0x244   :  { %v818_v15 = vpop.f32.mrb[17].mxu1  ;;  %v3494_v17 = vpop.f32.mrb[49].mxu0  ;;  %2570 = vtanh.f32 %v811_v53  ;;  %v817_v29 = vadd.f32 %v816_v8, %v3359_v48  ;;  %2296 = vmatpush1.bf16.msra.mxu1 %v2295_v13  ;;  %v1185_v53 = vld [vmem:[#allocation8 + $0x308] sm:$0xff]  ;;  %v1186_v8 = vld [vmem:[#allocation8 + $0x310] sm:$0xff] }
 0x245   :  { %v819_v22 = vadd.f32 %v818_v15, %v3364_v2  ;;  %v2561_v35 = vpop.eup %2560  ;;  %2298 = vmatprep.subr.bf16.mxu1 %v2297_v41  ;;  %v2307_v41 = vpack.c.bf16 %v1182_v58, %v1180_v19  ;;  %v2309_v57 = vpack.c.bf16 %v1187_v5, %v1185_v53  ;;  %v2311_v28 = vpack.c.bf16 %v1186_v8, %v1184_v0  ;;  %v1192_v5 = vld [vmem:[#allocation8 + $0x340] sm:$0xff] }
 0x246   :  { %v2563_v61 = vpop.eup %2562  ;;  %1322 = vmatprep.mubr.f32.mxu1 %v2561_v35 }
 0x247   :  { %v822_v6 = vpop.f32.mrb[18].mxu1  ;;  %v3498_v27 = vpop.f32.mrb[50].mxu0  ;;  %2572 = vtanh.f32 %v819_v22  ;;  %1323 = vmatmul.mubr.f32.gmra.mrb[42].mxu1 %v2563_v61 }
 0x248   :  { %v824_v52 = vpop.f32.mrb[19].mxu1  ;;  %v3500_v33 = vpop.f32.mrb[51].mxu0  ;;  %2574 = vtanh.f32 %v817_v29  ;;  %v823_v47 = vadd.f32 %v822_v6, %v3359_v48  ;;  %2300 = vmatpush1.bf16.msra.mxu1 %v2299_v20  ;;  %v1191_v29 = vld [vmem:[#allocation8 + $0x338] sm:$0xff]  ;;  %v1188_v6 = vld [vmem:[#allocation8 + $0x320] sm:$0xff] }
 0x249   :  { %v825_v49 = vadd.f32 %v824_v52, %v3364_v2  ;;  %v2565_v55 = vpop.eup %2564  ;;  %2302 = vmatprep.subr.bf16.mxu1 %v2301_v26  ;;  %v2313_v61 = vpack.c.bf16 %v1191_v29, %v1189_v51 }
 0x24a   :  { %v2567_v42 = vpop.eup %2566  ;;  %1328 = vmatprep.mubr.f32.mxu1 %v2565_v55 }
 0x24b   :  { %v828_v13 = vpop.f32.mrb[20].mxu1  ;;  %v3504_v50 = vpop.f32.mrb[52].mxu0  ;;  %2576 = vtanh.f32 %v825_v49  ;;  %1329 = vmatmul.mubr.f32.gmra.mrb[44].mxu1 %v2567_v42  ;;  %v1193_v49 = vld [vmem:[#allocation8 + $0x348] sm:$0xff]  ;;  %v2315_v42 = vpack.c.bf16 %v1190_v32, %v1188_v6 }
 0x24c   :  { %v830_v23 = vpop.f32.mrb[21].mxu1  ;;  %v3506_v12 = vpop.f32.mrb[53].mxu0  ;;  %2578 = vtanh.f32 %v823_v47  ;;  %v829_v11 = vadd.f32 %v828_v13, %v3359_v48  ;;  %2304 = vmatpush1.bf16.msra.mxu1 %v2303_v43  ;;  %v1195_v43 = vld [vmem:[#allocation8 + $0x358] sm:$0xff]  ;;  %v1201_v32 = vld [vmem:[#allocation8 + $0x388] sm:$0xff] }
 0x24d   :  { %v831_v30 = vadd.f32 %v830_v23, %v3364_v2  ;;  %v2569_v24 = vpop.eup %2568  ;;  %2306 = vmatprep.subr.bf16.mxu1 %v2305_v59  ;;  %v2317_v53 = vpack.c.bf16 %v1195_v43, %v1193_v49  ;;  %v1194_v23 = vld [vmem:[#allocation8 + $0x350] sm:$0xff] }
 0x24e   :  { %v2571_v10 = vpop.eup %2570  ;;  %1334 = vmatprep.mubr.f32.mxu1 %v2569_v24  ;;  %v1197_v24 = vld [vmem:[#allocation8 + $0x368] sm:$0xff]  ;;  %v2319_v51 = vpack.c.bf16 %v1194_v23, %v1192_v5  ;;  %v1200_v5 = vld [vmem:[#allocation8 + $0x380] sm:$0xff]  ;;  %v1202_v23 = vld [vmem:[#allocation8 + $0x390] sm:$0xff] }
 0x24f   :  { %v834_v16 = vpop.f32.mrb[22].mxu1  ;;  %v3510_v15 = vpop.f32.mrb[54].mxu0  ;;  %2580 = vtanh.f32 %v831_v30  ;;  %1335 = vmatmul.mubr.f32.gmra.mrb[46].mxu1 %v2571_v10 }
 0x250   :  { %v836_v22 = vpop.f32.mrb[23].mxu1  ;;  %v3512_v20 = vpop.f32.mrb[55].mxu0  ;;  %2582 = vtanh.f32 %v829_v11  ;;  %v835_v35 = vadd.f32 %v834_v16, %v3359_v48  ;;  %2308 = vmatpush1.bf16.msra.mxu1 %v2307_v41 }
 0x251   :  { %v837_v26 = vadd.f32 %v836_v22, %v3364_v2  ;;  %v2573_v56 = vpop.eup %2572  ;;  %2310 = vmatprep.subr.bf16.mxu1 %v2309_v57  ;;  %v1199_v57 = vld [vmem:[#allocation8 + $0x378] sm:$0xff]  ;;  %v696_v22 = vsub.s32 3, %v3346_v25 }
 0x252   :  { %v2575_v46 = vpop.eup %2574  ;;  %1340 = vmatprep.mubr.f32.mxu1 %v2573_v56 }
 0x253   :  { %v840_v52 = vpop.f32.mrb[24].mxu1  ;;  %v3516_v47 = vpop.f32.mrb[56].mxu0  ;;  %2584 = vtanh.f32 %v837_v26  ;;  %1341 = vmatmul.mubr.f32.gmra.mrb[48].mxu1 %v2575_v46  ;;  %v1196_v26 = vld [vmem:[#allocation8 + $0x360] sm:$0xff]  ;;  %v1203_v46 = vld [vmem:[#allocation8 + $0x398] sm:$0xff] }
 0x254   :  { %v842_v55 = vpop.f32.mrb[25].mxu1  ;;  %v3518_v59 = vpop.f32.mrb[57].mxu0  ;;  %2586 = vtanh.f32 %v835_v35  ;;  %v841_v19 = vadd.f32 %v840_v52, %v3359_v48  ;;  %2312 = vmatpush1.bf16.msra.mxu1 %v2311_v28  ;;  %v2321_v35 = vpack.c.bf16 %v1199_v57, %v1197_v24  ;;  %v1198_v28 = vld [vmem:[#allocation8 + $0x370] sm:$0xff]  ;;  %v692_v52 = vsub.s32 2, %v3346_v25  ;;  %v1205_v57 = vld [vmem:[#allocation8 + $0x3a8] sm:$0xff] }
 0x255   :  { %v843_v58 = vadd.f32 %v842_v55, %v3364_v2  ;;  %v2577_v13 = vpop.eup %2576  ;;  %2314 = vmatprep.subr.bf16.mxu1 %v2313_v61 }
 0x256   :  { %v2579_v11 = vpop.eup %2578  ;;  %1346 = vmatprep.mubr.f32.mxu1 %v2577_v13  ;;  %v3537_v13 = vrot.slane %v3355_v36, %v696_v22 }
 0x257   :  { %v846_v30 = vpop.f32.mrb[26].mxu1  ;;  %v3522_v41 = vpop.f32.mrb[58].mxu0  ;;  %2588 = vtanh.f32 %v843_v58  ;;  %1347 = vmatmul.mubr.f32.gmra.mrb[50].mxu1 %v2579_v11  ;;  %v2323_v58 = vpack.c.bf16 %v1198_v28, %v1196_v26 }
 0x258   :  { %v848_v0 = vpop.f32.mrb[27].mxu1  ;;  %v3524_v8 = vpop.f32.mrb[59].mxu0  ;;  %2590 = vtanh.f32 %v841_v19  ;;  %v847_v10 = vadd.f32 %v846_v30, %v3359_v48  ;;  %2316 = vmatpush1.bf16.msra.mxu1 %v2315_v42  ;;  %v932_v28 = vadd.f32 %v3368_v44, %v3537_v13  ;;  %v938_v44 = vadd.f32 %v3374_v45, %v3537_v13 }
 0x259   :  { %v849_v16 = vadd.f32 %v848_v0, %v3364_v2  ;;  %v2581_v29 = vpop.eup %2580  ;;  %2318 = vmatprep.subr.bf16.mxu1 %v2317_v53  ;;  %v2325_v53 = vpack.c.bf16 %v1203_v46, %v1201_v32  ;;  %v1207_v0 = vld [vmem:[#allocation8 + $0x3b8] sm:$0xff]  ;;  %v1209_v46 = vld [vmem:[#allocation8 + $0x3c8] sm:$0xff]  ;;  %v944_v45 = vadd.f32 %v3380_v21, %v3537_v13 }
 0x25a   :  { %v2583_v56 = vpop.eup %2582  ;;  %1352 = vmatprep.mubr.f32.mxu1 %v2581_v29 }
 0x25b   :  { %v852_v61 = vpop.f32.mrb[28].mxu1  ;;  %v3529_v6 = vpop.f32.mrb[60].mxu0  ;;  %2592 = vtanh.f32 %v849_v16  ;;  %1353 = vmatmul.mubr.f32.gmra.mrb[52].mxu1 %v2583_v56  ;;  %v2329_v56 = vpack.c.bf16 %v1207_v0, %v1205_v57  ;;  %v1212_v57 = vld [vmem:[#allocation8 + $0x3e0] sm:$0xff]  ;;  %v1214_v0 = vld [vmem:[#allocation8 + $0x3f0] sm:$0xff] }
 0x25c   :  { %v854_v49 = vpop.f32.mrb[29].mxu1  ;;  %v3532_v43 = vpop.f32.mrb[61].mxu0  ;;  %2594 = vtanh.f32 %v847_v10  ;;  %v853_v55 = vadd.f32 %v852_v61, %v3359_v48  ;;  %2320 = vmatpush1.bf16.msra.mxu1 %v2319_v51  ;;  %v3542_v10 = vrot.slane %v3355_v36, %v692_v52  ;;  %v1204_v36 = vld [vmem:[#allocation8 + $0x3a0] sm:$0xff]  ;;  %v1206_v61 = vld [vmem:[#allocation8 + $0x3b0] sm:$0xff]  ;;  %v1211_v52 = vld [vmem:[#allocation8 + $0x3d8] sm:$0xff] }
 0x25d   :  { %v855_v19 = vadd.f32 %v854_v49, %v3364_v2  ;;  %v2585_v42 = vpop.eup %2584  ;;  %2322 = vmatprep.subr.bf16.mxu1 %v2321_v35  ;;  %v2327_v35 = vpack.c.bf16 %v1202_v23, %v1200_v5  ;;  %v1215_v5 = vld [vmem:[#allocation8 + $0x3f8] sm:$0xff] }
 0x25e   :  { %v2587_v11 = vpop.eup %2586  ;;  %1358 = vmatprep.mubr.f32.mxu1 %v2585_v42 }
 0x25f   :  { %v858_v30 = vpop.f32.mrb[30].mxu1  ;;  %v3539_v24 = vpop.f32.mrb[62].mxu0  ;;  %2596 = vtanh.f32 %v855_v19  ;;  %1359 = vmatmul.mubr.f32.gmra.mrb[54].mxu1 %v2587_v11  ;;  %v1208_v19 = vld [vmem:[#allocation8 + $0x3c0] sm:$0xff] }
 0x260   :  { %v860_v16 = vpop.f32.mrb[31].mxu1  ;;  %v3544_v51 = vpop.f32.mrb[63].mxu0  ;;  %2598 = vtanh.f32 %v853_v55  ;;  %v859_v29 = vadd.f32 %v858_v30, %v3359_v48  ;;  %2324 = vmatpush1.bf16.msra.mxu1 %v2323_v58  ;;  %v930_v48 = vadd.f32 %v3366_v4, %v3542_v10  ;;  %v2333_v55 = vpack.c.bf16 %v1211_v52, %v1209_v46  ;;  %v1210_v58 = vld [vmem:[#allocation8 + $0x3d0] sm:$0xff] }
 0x261   :  { %v861_v22 = vadd.f32 %v860_v16, %v3364_v2  ;;  %v2589_v26 = vpop.eup %2588  ;;  %2326 = vmatprep.subr.bf16.mxu1 %v2325_v53  ;;  %v2331_v2 = vpack.c.bf16 %v1206_v61, %v1204_v36  ;;  %v1213_v53 = vld [vmem:[#allocation8 + $0x3e8] sm:$0xff]  ;;  %v936_v4 = vadd.f32 %v3372_v34, %v3542_v10  ;;  %v2335_v23 = vpack.c.bf16 %v1210_v58, %v1208_v19 }
 0x262   :  { %v2591_v32 = vpop.eup %2590  ;;  %1364 = vmatprep.mubr.f32.mxu1 %v2589_v26  ;;  %v2337_v30 = vpack.c.bf16 %v1215_v5, %v1213_v53  ;;  %v2339_v34 = vpack.c.bf16 %v1214_v0, %v1212_v57  ;;  %v962_v61 = vadd.f32 %v3446_v37, %v3537_v13  ;;  %v960_v46 = vadd.f32 %v3444_v3, %v3542_v10 }
 0x263   :  { %2600 = vtanh.f32 %v861_v22  ;;  %1365 = vmatmul.mubr.f32.gmra.mrb[56].mxu1 %v2591_v32  ;;  %v974_v37 = vadd.f32 %v3482_v63, %v3537_v13  ;;  %v972_v3 = vadd.f32 %v3480_v14, %v3542_v10  ;;  %v986_v63 = vadd.f32 %v3500_v33, %v3537_v13 }
 0x264   :  { %2602 = vtanh.f32 %v859_v29  ;;  %2328 = vmatpush1.bf16.msra.mxu1 %v2327_v35  ;;  %v942_v29 = vadd.f32 %v3378_v9, %v3542_v10  ;;  %v950_v35 = vadd.f32 %v3390_v62, %v3537_v13  ;;  %v956_v9 = vadd.f32 %v3426_v39, %v3537_v13 }
 0x265   :  { %v2593_v49 = vpop.eup %2592  ;;  %2604 = vtanh.f32 %v932_v28  ;;  %2330 = vmatprep.subr.bf16.mxu1 %v2329_v56  ;;  %v948_v28 = vadd.f32 %v3384_v38, %v3542_v10  ;;  %v954_v62 = vadd.f32 %v3421_v60, %v3542_v10  ;;  %v968_v39 = vadd.f32 %v3464_v18, %v3537_v13 }
 0x266   :  { %v2595_v42 = vpop.eup %2594  ;;  %1370 = vmatprep.mubr.f32.mxu1 %v2593_v49  ;;  %2606 = vtanh.f32 %v930_v48  ;;  %v966_v60 = vadd.f32 %v3462_v31, %v3542_v10  ;;  %v980_v18 = vadd.f32 %v3494_v17, %v3537_v13  ;;  %v978_v31 = vadd.f32 %v3492_v54, %v3542_v10 }
 0x267   :  { %1371 = vmatmul.mubr.f32.gmra.mrb[58].mxu1 %v2595_v42  ;;  %2608 = vtanh.f32 %v938_v44  ;;  %v984_v14 = vadd.f32 %v3498_v27, %v3542_v10  ;;  %v992_v17 = vadd.f32 %v3506_v12, %v3537_v13  ;;  %v990_v54 = vadd.f32 %v3504_v50, %v3542_v10 }
 0x268   :  { %2332 = vmatpush1.bf16.msra.mxu1 %v2331_v2  ;;  %2610 = vtanh.f32 %v936_v4  ;;  %v998_v33 = vadd.f32 %v3512_v20, %v3537_v13  ;;  %v996_v27 = vadd.f32 %v3510_v15, %v3542_v10  ;;  %v1004_v12 = vadd.f32 %v3518_v59, %v3537_v13 }
 0x269   :  { %v2597_v11 = vpop.eup %2596  ;;  %2334 = vmatprep.subr.bf16.mxu1 %v2333_v55  ;;  %2612 = vtanh.f32 %v944_v45  ;;  %v1002_v50 = vadd.f32 %v3516_v47, %v3542_v10  ;;  %v1010_v20 = vadd.f32 %v3524_v8, %v3537_v13  ;;  %v1008_v15 = vadd.f32 %v3522_v41, %v3542_v10 }
 0x26a   :  { %v2599_v16 = vpop.eup %2598  ;;  %1376 = vmatprep.mubr.f32.mxu1 %v2597_v11  ;;  %2614 = vtanh.f32 %v942_v29  ;;  %v1016_v59 = vadd.f32 %v3532_v43, %v3537_v13  ;;  %v1014_v47 = vadd.f32 %v3529_v6, %v3542_v10  ;;  %v1022_v8 = vadd.f32 %v3544_v51, %v3537_v13 }
 0x26b   :  { %1377 = vmatmul.mubr.f32.gmra.mrb[60].mxu1 %v2599_v16  ;;  %2616 = vtanh.f32 %v950_v35  ;;  %v1020_v41 = vadd.f32 %v3539_v24, %v3542_v10  ;;  %v1610_v24 = vld [vmem:[%s3731_s7 + $0xe0] sm:$0xff]  ;;  %v1611_v10 = vld [vmem:[%s3731_s7 + $0xe8] sm:$0xff] }
 0x26c   :  { %2336 = vmatpush1.bf16.msra.mxu1 %v2335_v23  ;;  %2618 = vtanh.f32 %v948_v28  ;;  %v1595_v28 = vld [vmem:[%s3731_s7 + $0x68] sm:$0xff] }
 0x26d   :  { %v2601_v22 = vpop.eup %2600  ;;  %2338 = vmatprep.subr.bf16.mxu1 %v2337_v30  ;;  %2620 = vtanh.f32 %v956_v9 }
 0x26e   :  { %v2603_v21 = vpop.eup %2602  ;;  %1382 = vmatprep.mubr.f32.mxu1 %v2601_v22  ;;  %2622 = vtanh.f32 %v954_v62 }
 0x26f   :  { %v2605_v26 = vpop.eup %2604  ;;  %1383 = vmatmul.mubr.f32.gmra.mrb[62].mxu1 %v2603_v21  ;;  %2624 = vtanh.f32 %v962_v61  ;;  %v2365_v21 = vpack.c.bf16 %v1611_v10, %v1610_v24  ;;  %v1596_v61 = vld [vmem:[%s3731_s7 + $0x70] sm:$0xff] }
 0x270   :  { %2340 = vmatpush1.bf16.msra.mxu1 %v2339_v34  ;;  %1453 = vmatprep.mubr.f32.mxu1 %v2605_v26  ;;  %v2607_v56 = vpop.eup %2606  ;;  %2626 = vtanh.f32 %v960_v46  ;;  %v1594_v26 = vld [vmem:[%s3731_s7 + $0x60] sm:$0xff] }
 0x271   :  { %v2609_v36 = vpop.eup %2608  ;;  %2628 = vtanh.f32 %v968_v39  ;;  %v2367_v9 = vpack.c.bf16 %v1595_v28, %v1594_v26  ;;  %2366 = vmatprep.subr.bf16.mxu0 %v2365_v21  ;;  %v1216_v46 = vld [vmem:[%s3730_s6] sm:$0x3] }
 0x272   :  { %v2611_v32 = vpop.eup %2610  ;;  %2630 = vtanh.f32 %v966_v60  ;;  %v3640_v39 = vrot.slane %v1216_v46, %v3349_v1 }
 0x273   :  { %1454 = vmatmul.mubr.f32.vlgmr.msra.gmra.mrb[32].mxu1 %v2607_v56  ;;  %v2613_v38 = vpop.eup %2612  ;;  %2632 = vtanh.f32 %v974_v37  ;;  %2368 = vmatpush3.bf16.msra.mxu0 %v2367_v9  ;;  %v1612_v56 = vld [vmem:[%s3731_s7 + $0xf0] sm:$0xff] }
 0x274   :  { %1459 = vmatprep.mubr.f32.mxu1 %v2609_v36  ;;  %v2615_v52 = vpop.eup %2614  ;;  %2634 = vtanh.f32 %v972_v3  ;;  %v1613_v36 = vld [vmem:[%s3731_s7 + $0xf8] sm:$0xff] }
 0x275   :  { %v2617_v48 = vpop.eup %2616  ;;  %2636 = vtanh.f32 %v980_v18  ;;  %v2369_v62 = vpack.c.bf16 %v1613_v36, %v1612_v56 }
 0x276   :  { %v2619_v2 = vpop.eup %2618  ;;  %2638 = vtanh.f32 %v978_v31 }
 0x277   :  { %1460 = vmatmul.mubr.f32.gmra.mrb[34].mxu1 %v2611_v32  ;;  %v2621_v49 = vpop.eup %2620  ;;  %2640 = vtanh.f32 %v986_v63  ;;  %v1597_v32 = vld [vmem:[%s3731_s7 + $0x78] sm:$0xff]  ;;  %2370 = vmatprep.subr.bf16.mxu0 %v2369_v62 }
 0x278   :  { %1465 = vmatprep.mubr.f32.mxu1 %v2613_v38  ;;  %v2623_v44 = vpop.eup %2622  ;;  %2642 = vtanh.f32 %v984_v14  ;;  %v2371_v38 = vpack.c.bf16 %v1597_v32, %v1596_v61 }
 0x279   :  { %v2625_v55 = vpop.eup %2624  ;;  %2644 = vtanh.f32 %v992_v17 }
 0x27a   :  { %v2627_v19 = vpop.eup %2626  ;;  %2646 = vtanh.f32 %v990_v54  ;;  %2372 = vmatpush3.bf16.msra.mxu0 %v2371_v38 }
 0x27b   :  { %1466 = vmatmul.mubr.f32.gmra.mrb[36].mxu1 %v2615_v52  ;;  %v2629_v58 = vpop.eup %2628  ;;  %2648 = vtanh.f32 %v998_v33  ;;  %v3644_v52 = vrot.slane %v1216_v46, %v688_v40 }
 0x27c   :  { %1471 = vmatprep.mubr.f32.mxu1 %v2617_v48  ;;  %v2631_v42 = vpop.eup %2630  ;;  %2650 = vtanh.f32 %v996_v27 }
 0x27d   :  { %v2633_v53 = vpop.eup %2632  ;;  %2652 = vtanh.f32 %v1004_v12 }
 0x27e   :  { %v2635_v5 = vpop.eup %2634  ;;  %2654 = vtanh.f32 %v1002_v50 }
 0x27f   :  { %1472 = vmatmul.mubr.f32.gmra.mrb[38].mxu1 %v2619_v2  ;;  %v2637_v4 = vpop.eup %2636  ;;  %2656 = vtanh.f32 %v1010_v20 }
 0x280   :  { %1477 = vmatprep.mubr.f32.mxu1 %v2621_v49  ;;  %v2639_v23 = vpop.eup %2638  ;;  %2658 = vtanh.f32 %v1008_v15 }
 0x281   :  { %v2641_v11 = vpop.eup %2640  ;;  %2660 = vtanh.f32 %v1016_v59 }
 0x282   :  { %v2643_v45 = vpop.eup %2642  ;;  %2662 = vtanh.f32 %v1014_v47 }
 0x283   :  { %1478 = vmatmul.mubr.f32.gmra.mrb[40].mxu1 %v2623_v44  ;;  %v2645_v30 = vpop.eup %2644  ;;  %2664 = vtanh.f32 %v1022_v8 }
 0x284   :  { %1483 = vmatprep.mubr.f32.mxu1 %v2625_v55  ;;  %v2647_v57 = vpop.eup %2646  ;;  %2666 = vtanh.f32 %v1020_v41 }
 0x285   :  { %v2649_v0 = vpop.eup %2648 }
 0x286   :  { %v2651_v16 = vpop.eup %2650 }
 0x287   :  { %1484 = vmatmul.mubr.f32.gmra.mrb[42].mxu1 %v2627_v19  ;;  %v2653_v29 = vpop.eup %2652 }
 0x288   :  { %1489 = vmatprep.mubr.f32.mxu1 %v2629_v58  ;;  %v2655_v43 = vpop.eup %2654 }
 0x289   :  { %v2657_v34 = vpop.eup %2656 }
 0x28a   :  { %v2659_v6 = vpop.eup %2658 }
 0x28b   :  { %1490 = vmatmul.mubr.f32.gmra.mrb[44].mxu1 %v2631_v42  ;;  %v2661_v22 = vpop.eup %2660 }
 0x28c   :  { %1495 = vmatprep.mubr.f32.mxu1 %v2633_v53  ;;  %v2663_v35 = vpop.eup %2662 }
 0x28d   :  { %v2665_v13 = vpop.eup %2664 }
 0x28e   :  { %v2667_v51 = vpop.eup %2666 }
 0x28f   :  { %1496 = vmatmul.mubr.f32.gmra.mrb[46].mxu1 %v2635_v5 }
 0x290   :  { %1501 = vmatprep.mubr.f32.mxu1 %v2637_v4 }
 0x293   :  { %1502 = vmatmul.mubr.f32.gmra.mrb[48].mxu1 %v2639_v23 }
 0x294   :  { %1507 = vmatprep.mubr.f32.mxu1 %v2641_v11 }
 0x297   :  { %1508 = vmatmul.mubr.f32.gmra.mrb[50].mxu1 %v2643_v45 }
 0x298   :  { %1513 = vmatprep.mubr.f32.mxu1 %v2645_v30 }
 0x29b   :  { %1514 = vmatmul.mubr.f32.gmra.mrb[52].mxu1 %v2647_v57 }
 0x29c   :  { %1519 = vmatprep.mubr.f32.mxu1 %v2649_v0 }
 0x29f   :  { %1520 = vmatmul.mubr.f32.gmra.mrb[54].mxu1 %v2651_v16 }
 0x2a0   :  { %1525 = vmatprep.mubr.f32.mxu1 %v2653_v29 }
 0x2a3   :  { %1526 = vmatmul.mubr.f32.gmra.mrb[56].mxu1 %v2655_v43 }
 0x2a4   :  { %1531 = vmatprep.mubr.f32.mxu1 %v2657_v34 }
 0x2a7   :  { %1532 = vmatmul.mubr.f32.gmra.mrb[58].mxu1 %v2659_v6 }
 0x2a8   :  { %1537 = vmatprep.mubr.f32.mxu1 %v2661_v22 }
 0x2ab   :  { %1538 = vmatmul.mubr.f32.gmra.mrb[60].mxu1 %v2663_v35 }
 0x2ac   :  { %1543 = vmatprep.mubr.f32.mxu1 %v2665_v13 }
 0x2af   :  { %1544 = vmatmul.mubr.f32.gmra.mrb[62].mxu1 %v2667_v51 }
 0x346   :  { %v1455_v48 = vpop.f32.mrb[32].mxu1 }
 0x347   :  { %v2397_v60 = vadd.f32 %v1455_v48, %v3640_v39  ;;  %v1457_v37 = vpop.f32.mrb[33].mxu1 }
 0x348   :  { %v2398_v2 = vadd.f32 %v1457_v37, %v3644_v52 }
 0x34a   :  { %2668 = vtanh.f32 %v2398_v2  ;;  %v1461_v49 = vpop.f32.mrb[34].mxu1 }
 0x34b   :  { %2670 = vtanh.f32 %v2397_v60  ;;  %v2399_v3 = vadd.f32 %v1461_v49, %v3640_v39  ;;  %v1463_v18 = vpop.f32.mrb[35].mxu1 }
 0x34c   :  { %v2400_v44 = vadd.f32 %v1463_v18, %v3644_v52 }
 0x34e   :  { %2672 = vtanh.f32 %v2400_v44  ;;  %v1467_v55 = vpop.f32.mrb[36].mxu1 }
 0x34f   :  { %2674 = vtanh.f32 %v2399_v3  ;;  %v2401_v25 = vadd.f32 %v1467_v55, %v3640_v39  ;;  %v1469_v40 = vpop.f32.mrb[37].mxu1 }
 0x350   :  { %v2402_v31 = vadd.f32 %v1469_v40, %v3644_v52 }
 0x352   :  { %2676 = vtanh.f32 %v2402_v31  ;;  %v1473_v63 = vpop.f32.mrb[38].mxu1 }
 0x353   :  { %2678 = vtanh.f32 %v2401_v25  ;;  %v2403_v19 = vadd.f32 %v1473_v63, %v3640_v39  ;;  %v1475_v58 = vpop.f32.mrb[39].mxu1 }
 0x354   :  { %v2669_v14 = vpop.eup %2668  ;;  %v2404_v17 = vadd.f32 %v1475_v58, %v3644_v52 }
 0x355   :  { %v2671_v42 = vpop.eup %2670  ;;  %1685 = vmatprep.mubr.f32.mxu0 %v2669_v14 }
 0x356   :  { %2680 = vtanh.f32 %v2404_v17  ;;  %v1479_v53 = vpop.f32.mrb[40].mxu1  ;;  %1686 = vmatmul.mubr.f32.vlgmr.msra.gmra.mrb[64].mxu0 %v2671_v42 }
 0x357   :  { %2682 = vtanh.f32 %v2403_v19  ;;  %v2405_v54 = vadd.f32 %v1479_v53, %v3640_v39  ;;  %v1481_v33 = vpop.f32.mrb[41].mxu1 }
 0x358   :  { %v2673_v5 = vpop.eup %2672  ;;  %v2406_v4 = vadd.f32 %v1481_v33, %v3644_v52 }
 0x359   :  { %v2675_v27 = vpop.eup %2674  ;;  %1690 = vmatprep.mubr.f32.mxu0 %v2673_v5 }
 0x35a   :  { %2684 = vtanh.f32 %v2406_v4  ;;  %v1485_v12 = vpop.f32.mrb[42].mxu1  ;;  %1691 = vmatmul.mubr.f32.gmra.mrb[66].mxu0 %v2675_v27 }
 0x35b   :  { %2686 = vtanh.f32 %v2405_v54  ;;  %v2407_v23 = vadd.f32 %v1485_v12, %v3640_v39  ;;  %v1487_v11 = vpop.f32.mrb[43].mxu1 }
 0x35c   :  { %v2677_v50 = vpop.eup %2676  ;;  %v2408_v20 = vadd.f32 %v1487_v11, %v3644_v52 }
 0x35d   :  { %v2679_v45 = vpop.eup %2678  ;;  %1695 = vmatprep.mubr.f32.mxu0 %v2677_v50 }
 0x35e   :  { %2688 = vtanh.f32 %v2408_v20  ;;  %v1491_v30 = vpop.f32.mrb[44].mxu1  ;;  %1696 = vmatmul.mubr.f32.gmra.mrb[68].mxu0 %v2679_v45 }
 0x35f   :  { %2690 = vtanh.f32 %v2407_v23  ;;  %v2409_v15 = vadd.f32 %v1491_v30, %v3640_v39  ;;  %v1493_v59 = vpop.f32.mrb[45].mxu1 }
 0x360   :  { %v2681_v57 = vpop.eup %2680  ;;  %v2410_v0 = vadd.f32 %v1493_v59, %v3644_v52 }
 0x361   :  { %v2683_v47 = vpop.eup %2682  ;;  %1700 = vmatprep.mubr.f32.mxu0 %v2681_v57 }
 0x362   :  { %2692 = vtanh.f32 %v2410_v0  ;;  %v1497_v8 = vpop.f32.mrb[46].mxu1  ;;  %1701 = vmatmul.mubr.f32.gmra.mrb[70].mxu0 %v2683_v47 }
 0x363   :  { %2694 = vtanh.f32 %v2409_v15  ;;  %v2411_v16 = vadd.f32 %v1497_v8, %v3640_v39  ;;  %v1499_v29 = vpop.f32.mrb[47].mxu1  ;;  %v2872_v8 = vmov 0  }
 0x364   :  { %v2685_v41 = vpop.eup %2684  ;;  %v2412_v43 = vadd.f32 %v1499_v29, %v3644_v52  ;;  %2475 = vset.pattern.permute.xlu0 %v2872_v8 }
 0x365   :  { %v2687_v34 = vpop.eup %2686  ;;  %1705 = vmatprep.mubr.f32.mxu0 %v2685_v41  ;;  %v3683_v41 = vld [vmem:[%s3732_s8] ss:$0 sm:$0xff] }
 0x366   :  { %2696 = vtanh.f32 %v2412_v43  ;;  %v1503_v6 = vpop.f32.mrb[48].mxu1  ;;  %1706 = vmatmul.mubr.f32.gmra.mrb[72].mxu0 %v2687_v34 }
 0x367   :  { %2698 = vtanh.f32 %v2411_v16  ;;  %v2413_v22 = vadd.f32 %v1503_v6, %v3640_v39  ;;  %v1505_v35 = vpop.f32.mrb[49].mxu1 }
 0x368   :  { %v2689_v13 = vpop.eup %2688  ;;  %v2414_v51 = vadd.f32 %v1505_v35, %v3644_v52 }
 0x369   :  { %v2691_v24 = vpop.eup %2690  ;;  %1710 = vmatprep.mubr.f32.mxu0 %v2689_v13 }
 0x36a   :  { %2700 = vtanh.f32 %v2414_v51  ;;  %v1509_v10 = vpop.f32.mrb[50].mxu1  ;;  %1711 = vmatmul.mubr.f32.gmra.mrb[74].mxu0 %v2691_v24 }
 0x36b   :  { %2702 = vtanh.f32 %v2413_v22  ;;  %v2415_v21 = vadd.f32 %v1509_v10, %v3640_v39  ;;  %v1511_v26 = vpop.f32.mrb[51].mxu1 }
 0x36c   :  { %v2693_v28 = vpop.eup %2692  ;;  %v2416_v9 = vadd.f32 %v1511_v26, %v3644_v52 }
 0x36d   :  { %v2695_v56 = vpop.eup %2694  ;;  %1715 = vmatprep.mubr.f32.mxu0 %v2693_v28 }
 0x36e   :  { %2704 = vtanh.f32 %v2416_v9  ;;  %v1515_v36 = vpop.f32.mrb[52].mxu1  ;;  %1716 = vmatmul.mubr.f32.gmra.mrb[76].mxu0 %v2695_v56 }
 0x36f   :  { %2706 = vtanh.f32 %v2415_v21  ;;  %v2417_v62 = vadd.f32 %v1515_v36, %v3640_v39  ;;  %v1517_v61 = vpop.f32.mrb[53].mxu1 }
 0x370   :  { %v2697_v32 = vpop.eup %2696  ;;  %v2418_v38 = vadd.f32 %v1517_v61, %v3644_v52 }
 0x371   :  { %v2699_v46 = vpop.eup %2698  ;;  %1720 = vmatprep.mubr.f32.mxu0 %v2697_v32 }
 0x372   :  { %2708 = vtanh.f32 %v2418_v38  ;;  %v1521_v48 = vpop.f32.mrb[54].mxu1  ;;  %1721 = vmatmul.mubr.f32.gmra.mrb[78].mxu0 %v2699_v46 }
 0x373   :  { %2710 = vtanh.f32 %v2417_v62  ;;  %v2419_v60 = vadd.f32 %v1521_v48, %v3640_v39  ;;  %v1523_v37 = vpop.f32.mrb[55].mxu1 }
 0x374   :  { %v2701_v2 = vpop.eup %2700  ;;  %v2420_v49 = vadd.f32 %v1523_v37, %v3644_v52 }
 0x375   :  { %v2703_v3 = vpop.eup %2702  ;;  %1725 = vmatprep.mubr.f32.mxu0 %v2701_v2 }
 0x376   :  { %2712 = vtanh.f32 %v2420_v49  ;;  %v1527_v18 = vpop.f32.mrb[56].mxu1  ;;  %1726 = vmatmul.mubr.f32.gmra.mrb[80].mxu0 %v2703_v3 }
 0x377   :  { %2714 = vtanh.f32 %v2419_v60  ;;  %v2421_v44 = vadd.f32 %v1527_v18, %v3640_v39  ;;  %v1529_v55 = vpop.f32.mrb[57].mxu1 }
 0x378   :  { %v2705_v25 = vpop.eup %2704  ;;  %v2422_v40 = vadd.f32 %v1529_v55, %v3644_v52 }
 0x379   :  { %v2707_v31 = vpop.eup %2706  ;;  %1730 = vmatprep.mubr.f32.mxu0 %v2705_v25 }
 0x37a   :  { %2716 = vtanh.f32 %v2422_v40  ;;  %v1533_v63 = vpop.f32.mrb[58].mxu1  ;;  %1731 = vmatmul.mubr.f32.gmra.mrb[82].mxu0 %v2707_v31 }
 0x37b   :  { %2718 = vtanh.f32 %v2421_v44  ;;  %v2423_v19 = vadd.f32 %v1533_v63, %v3640_v39  ;;  %v1535_v58 = vpop.f32.mrb[59].mxu1 }
 0x37c   :  { %v2709_v14 = vpop.eup %2708  ;;  %v2424_v17 = vadd.f32 %v1535_v58, %v3644_v52 }
 0x37d   :  { %v2711_v42 = vpop.eup %2710  ;;  %1735 = vmatprep.mubr.f32.mxu0 %v2709_v14 }
 0x37e   :  { %2720 = vtanh.f32 %v2424_v17  ;;  %v1539_v53 = vpop.f32.mrb[60].mxu1  ;;  %1736 = vmatmul.mubr.f32.gmra.mrb[84].mxu0 %v2711_v42 }
 0x37f   :  { %2722 = vtanh.f32 %v2423_v19  ;;  %v2425_v54 = vadd.f32 %v1539_v53, %v3640_v39  ;;  %v1541_v33 = vpop.f32.mrb[61].mxu1 }
 0x380   :  { %v2713_v5 = vpop.eup %2712  ;;  %v2426_v4 = vadd.f32 %v1541_v33, %v3644_v52 }
 0x381   :  { %v2715_v27 = vpop.eup %2714  ;;  %1740 = vmatprep.mubr.f32.mxu0 %v2713_v5 }
 0x382   :  { %2724 = vtanh.f32 %v2426_v4  ;;  %v1545_v12 = vpop.f32.mrb[62].mxu1  ;;  %1741 = vmatmul.mubr.f32.gmra.mrb[86].mxu0 %v2715_v27 }
 0x383   :  { %2726 = vtanh.f32 %v2425_v54  ;;  %v2427_v23 = vadd.f32 %v1545_v12, %v3640_v39  ;;  %v1547_v11 = vpop.f32.mrb[63].mxu1  ;;  %v2870_v39 = vmov 0.0|0.0  }
 0x384   :  { %v2717_v50 = vpop.eup %2716  ;;  %v2428_v20 = vadd.f32 %v1547_v11, %v3644_v52  ;;  %2373 = vmatprep.subr.bf16.mxu0 %v2870_v39  ;;  %v1783_v52 = vld [vmem:[#allocation2] sm:$0x1] }
 0x385   :  { %v2719_v45 = vpop.eup %2718  ;;  %1745 = vmatprep.mubr.f32.mxu0 %v2717_v50  ;;  %1786 = vperm.xlu0 %2475, %v1783_v52  }
 0x386   :  { %2728 = vtanh.f32 %v2428_v20  ;;  %1746 = vmatmul.mubr.f32.gmra.mrb[88].mxu0 %v2719_v45 }
 0x387   :  { %2730 = vtanh.f32 %v2427_v23 }
 0x388   :  { %v2721_v30 = vpop.eup %2720 }
 0x389   :  { %v2723_v15 = vpop.eup %2722  ;;  %1750 = vmatprep.mubr.f32.mxu0 %v2721_v30 }
 0x38a   :  { %1751 = vmatmul.mubr.f32.gmra.mrb[90].mxu0 %v2723_v15 }
 0x38c   :  { %v2725_v59 = vpop.eup %2724 }
 0x38d   :  { %v2727_v57 = vpop.eup %2726  ;;  %1755 = vmatprep.mubr.f32.mxu0 %v2725_v59 }
 0x38e   :  { %1756 = vmatmul.mubr.f32.gmra.mrb[92].mxu0 %v2727_v57 }
 0x390   :  { %v2729_v0 = vpop.eup %2728 }
 0x391   :  { %v2731_v47 = vpop.eup %2730  ;;  %1760 = vmatprep.mubr.f32.mxu0 %v2729_v0 }
 0x392   :  { %1761 = vmatmul.mubr.f32.gmra.mrb[94].mxu0 %v2731_v47 }
 0x393   :  { %2138 = vmatprep.mubr.msk.f32.mxu0 %vm2871_vm1, %v2869_v7 }
 0x429   :  { %v1985_v16 = vpop.f32.mrb[64].mxu0 }
 0x42a   :  { %v1986_v29 = vpop.f32.mrb[65].mxu0 }
 0x42b   :  { %v1987_v43 = vadd.f32 %v1986_v29, %v1985_v16 }
 0x42d   :  { %v1988_v34 = vpop.f32.mrb[66].mxu0  ;;  %v1688_v6 = vadd.f32 %v1987_v43, %v3683_v41 }
 0x42e   :  { %v1989_v22 = vpop.f32.mrb[67].mxu0 }
 0x42f   :  { %v1990_v35 = vadd.f32 %v1989_v22, %v1988_v34  ;;  %2732 = vtanh.f32 %v1688_v6 }
 0x431   :  { %v1693_v13 = vadd.f32 %v1990_v35, %v3683_v41  ;;  %v1991_v7 = vpop.f32.mrb[68].mxu0 }
 0x432   :  { %v1992_v51 = vpop.f32.mrb[69].mxu0 }
 0x433   :  { %2734 = vtanh.f32 %v1693_v13  ;;  %v1993_v24 = vadd.f32 %v1992_v51, %v1991_v7 }
 0x435   :  { %v1994_v10 = vpop.f32.mrb[70].mxu0  ;;  %v1698_v21 = vadd.f32 %v1993_v24, %v3683_v41 }
 0x436   :  { %v1995_v26 = vpop.f32.mrb[71].mxu0 }
 0x437   :  { %v1996_v28 = vadd.f32 %v1995_v26, %v1994_v10  ;;  %2736 = vtanh.f32 %v1698_v21 }
 0x439   :  { %v1703_v9 = vadd.f32 %v1996_v28, %v3683_v41  ;;  %v1997_v56 = vpop.f32.mrb[72].mxu0  ;;  %v2733_v61 = vpop.eup %2732 }
 0x43a   :  { %v1998_v36 = vpop.f32.mrb[73].mxu0 }
 0x43b   :  { %2738 = vtanh.f32 %v1703_v9  ;;  %v1999_v62 = vadd.f32 %v1998_v36, %v1997_v56 }
 0x43d   :  { %v2735_v32 = vpop.eup %2734  ;;  %v2000_v38 = vpop.f32.mrb[74].mxu0  ;;  %v1708_v46 = vadd.f32 %v1999_v62, %v3683_v41 }
 0x43e   :  { %v2001_v48 = vpop.f32.mrb[75].mxu0  ;;  %v2374_v60 = vpack.c.bf16 %v2735_v32, %v2733_v61 }
 0x43f   :  { %v2002_v37 = vadd.f32 %v2001_v48, %v2000_v38  ;;  %2740 = vtanh.f32 %v1708_v46 }
 0x440   :  { %2375 = vmatpush3.bf16.xpose.msra.mxu0 %v2374_v60 }
 0x441   :  { %v1713_v2 = vadd.f32 %v2002_v37, %v3683_v41  ;;  %v2003_v49 = vpop.f32.mrb[76].mxu0  ;;  %2376 = vmatprep.subr.bf16.mxu0 %v2870_v39  ;;  %v2737_v44 = vpop.eup %2736 }
 0x442   :  { %v2004_v3 = vpop.f32.mrb[77].mxu0 }
 0x443   :  { %2742 = vtanh.f32 %v1713_v2  ;;  %v2005_v18 = vadd.f32 %v2004_v3, %v2003_v49  ;;  %v1782_v49 = vld [vmem:[%s3733_s9] sm:$0x1] }
 0x445   :  { %v2739_v55 = vpop.eup %2738  ;;  %v2006_v25 = vpop.f32.mrb[78].mxu0  ;;  %v1718_v40 = vadd.f32 %v2005_v18, %v3683_v41 }
 0x446   :  { %v2007_v31 = vpop.f32.mrb[79].mxu0  ;;  %v2377_v63 = vpack.c.bf16 %v2739_v55, %v2737_v44 }
 0x447   :  { %v2008_v19 = vadd.f32 %v2007_v31, %v2006_v25  ;;  %2744 = vtanh.f32 %v1718_v40 }
 0x448   :  { %2378 = vmatpush3.bf16.xpose.msra.mxu0 %v2377_v63 }
 0x449   :  { %v1723_v58 = vadd.f32 %v2008_v19, %v3683_v41  ;;  %v2009_v14 = vpop.f32.mrb[80].mxu0  ;;  %2379 = vmatprep.subr.bf16.mxu0 %v2870_v39  ;;  %v2741_v53 = vpop.eup %2740 }
 0x44a   :  { %v2010_v17 = vpop.f32.mrb[81].mxu0 }
 0x44b   :  { %2746 = vtanh.f32 %v1723_v58  ;;  %v2011_v42 = vadd.f32 %v2010_v17, %v2009_v14 }
 0x44d   :  { %v2743_v54 = vpop.eup %2742  ;;  %v2012_v33 = vpop.f32.mrb[82].mxu0  ;;  %v1728_v5 = vadd.f32 %v2011_v42, %v3683_v41 }
 0x44e   :  { %v2013_v4 = vpop.f32.mrb[83].mxu0  ;;  %v2380_v27 = vpack.c.bf16 %v2743_v54, %v2741_v53 }
 0x44f   :  { %v2014_v12 = vadd.f32 %v2013_v4, %v2012_v33  ;;  %2748 = vtanh.f32 %v1728_v5 }
 0x450   :  { %2381 = vmatpush3.bf16.xpose.msra.mxu0 %v2380_v27 }
 0x451   :  { %v1733_v23 = vadd.f32 %v2014_v12, %v3683_v41  ;;  %v2015_v11 = vpop.f32.mrb[84].mxu0  ;;  %2382 = vmatprep.subr.bf16.mxu0 %v2870_v39  ;;  %v2745_v45 = vpop.eup %2744 }
 0x452   :  { %v2016_v50 = vpop.f32.mrb[85].mxu0 }
 0x453   :  { %2750 = vtanh.f32 %v1733_v23  ;;  %v2017_v20 = vadd.f32 %v2016_v50, %v2015_v11 }
 0x455   :  { %v2747_v30 = vpop.eup %2746  ;;  %v2018_v15 = vpop.f32.mrb[86].mxu0  ;;  %v1738_v59 = vadd.f32 %v2017_v20, %v3683_v41 }
 0x456   :  { %v2019_v57 = vpop.f32.mrb[87].mxu0  ;;  %v2383_v0 = vpack.c.bf16 %v2747_v30, %v2745_v45 }
 0x457   :  { %v2020_v47 = vadd.f32 %v2019_v57, %v2018_v15  ;;  %2752 = vtanh.f32 %v1738_v59 }
 0x458   :  { %2384 = vmatpush3.bf16.xpose.msra.mxu0 %v2383_v0 }
 0x459   :  { %v1743_v52 = vadd.f32 %v2020_v47, %v3683_v41  ;;  %v2021_v8 = vpop.f32.mrb[88].mxu0  ;;  %2385 = vmatprep.subr.bf16.mxu0 %v2870_v39  ;;  %v2749_v43 = vpop.eup %2748 }
 0x45a   :  { %v2022_v16 = vpop.f32.mrb[89].mxu0 }
 0x45b   :  { %2754 = vtanh.f32 %v1743_v52  ;;  %v2023_v29 = vadd.f32 %v2022_v16, %v2021_v8 }
 0x45d   :  { %v2751_v34 = vpop.eup %2750  ;;  %v2024_v6 = vpop.f32.mrb[90].mxu0  ;;  %v1748_v22 = vadd.f32 %v2023_v29, %v3683_v41 }
 0x45e   :  { %v2025_v35 = vpop.f32.mrb[91].mxu0  ;;  %v2386_v13 = vpack.c.bf16 %v2751_v34, %v2749_v43 }
 0x45f   :  { %v2026_v7 = vadd.f32 %v2025_v35, %v2024_v6  ;;  %2756 = vtanh.f32 %v1748_v22 }
 0x460   :  { %2387 = vmatpush3.bf16.xpose.msra.mxu0 %v2386_v13 }
 0x461   :  { %v1753_v51 = vadd.f32 %v2026_v7, %v3683_v41  ;;  %v2027_v24 = vpop.f32.mrb[92].mxu0  ;;  %2388 = vmatprep.subr.bf16.mxu0 %v2870_v39  ;;  %v2753_v26 = vpop.eup %2752 }
 0x462   :  { %v2028_v10 = vpop.f32.mrb[93].mxu0 }
 0x463   :  { %2758 = vtanh.f32 %v1753_v51  ;;  %v2029_v21 = vadd.f32 %v2028_v10, %v2027_v24 }
 0x465   :  { %v2755_v28 = vpop.eup %2754  ;;  %v2030_v9 = vpop.f32.mrb[94].mxu0  ;;  %v1758_v56 = vadd.f32 %v2029_v21, %v3683_v41 }
 0x466   :  { %v2031_v36 = vpop.f32.mrb[95].mxu0  ;;  %v2389_v62 = vpack.c.bf16 %v2755_v28, %v2753_v26 }
 0x467   :  { %v2032_v61 = vadd.f32 %v2031_v36, %v2030_v9  ;;  %2760 = vtanh.f32 %v1758_v56 }
 0x468   :  { %2390 = vmatpush3.bf16.xpose.msra.mxu0 %v2389_v62 }
 0x469   :  { %v1763_v32 = vadd.f32 %v2032_v61, %v3683_v41  ;;  %2391 = vmatprep.subr.bf16.mxu0 %v2870_v39  ;;  %v2757_v38 = vpop.eup %2756  ;;  %v1787_v41 = vpop.permute.xlu0 %1786 }
 0x46a   :  { %v1792_v3 = vrot.slane %v1787_v41, %v3349_v1 }
 0x46b   :  { %2762 = vtanh.f32 %v1763_v32 }
 0x46d   :  { %v2759_v46 = vpop.eup %2758 }
 0x46e   :  { %v2392_v48 = vpack.c.bf16 %v2759_v46, %v2757_v38 }
 0x470   :  { %2393 = vmatpush3.bf16.xpose.msra.mxu0 %v2392_v48 }
 0x471   :  { %2394 = vmatprep.subr.bf16.mxu0 %v2870_v39  ;;  %v2761_v60 = vpop.eup %2760 }
 0x475   :  { %v2763_v37 = vpop.eup %2762 }
 0x476   :  { %v2395_v2 = vpack.c.bf16 %v2763_v37, %v2761_v60 }
 0x478   :  { %2396 = vmatpush3.bf16.xpose.msra.mxu0 %v2395_v2 }
 0x47f   :  { %2139 = vmatmul.mubr.f32.vlgmr.msra.gmra.mrb[96].mxu0 %v1782_v49 }
 0x552   :  { %v1859_v18 = vpop.f32.mrb[96].mxu0 }
 0x553   :  { %v1860_v44 = vadd.f32 %v1859_v18, %v1792_v3  ;;  %v2140_v55 = vpop.f32.mrb[97].mxu0 }
 0x555   :  { %v1863_v25 = vmul.f32 0.5, %v1860_v44 }
 0x557   :  { %2764 = vtanh.f32 %v1863_v25 }
 0x561   :  { %v2765_v40 = vpop.eup %2764 }
 0x562   :  { %v1865_v39 = vmul.f32 0.5, %v2765_v40 }
 0x564   :  { %v1866_v31 = vadd.f32 0.5, %v1865_v39 }
 0x566   :  { %1867 = vst [vmem:[#allocation9] sm:$0x1] %v1866_v31 }
 0x567   :  { %2843 = shalt.err (!%p2840_p0)
}
 0x568   :  { %s2844_s1 = scalar_lea.hbm %s3735_s11, 16 }
 0x569   :  { %p2845_p1 = scmp.ne.s32.totalorder %s3735_s11, %s2844_s1  ;;  %p2848_p2 = scmp.lt.u32.totalorder %s2844_s1, %s3735_s11 }
 0x56b   :  { %p2850_p3 = pnand %p2848_p2, %p2845_p1 }
 0x56d   :  { %2853 = shalt.err (!%p2850_p3)
}
 0x56e   :  { %1877 = dma.vmem_to_hbm [thread:$0]  %s1875_s12, 16, %s3735_s11, [#allocation5]  }
 0x56f   :  { %2858 = dma.done.wait [#allocation5], 16  }
 0x570   :  { %2859 = vsyncadd [#allocation5], 4294967280 }
 0x571   :  { %1881 = vsyncpa [#allocation4], 1 }
 0x572   :  { %1882 = vsyncpa [#allocation7], 1 }
 0x573   :  { %1883 = vsyncpa [#allocation5], 1 }

</bundles_post_ra>
